<compile_context>
chip_gen: v7x
topology: tpu7x:2x2x1
jax: 0.10.0
libtpu: 0.0.40
codegen_flags: <defaults>
</compile_context>

<pallas_src>
import functools

import jax
import jax.numpy as jnp
from jax import lax
from jax.experimental import pallas as pl
from jax.experimental.pallas import tpu as pltpu

EPS = 1e-5
LANE = 128                      # channel dims zero-padded to multiples of this
VMEM_LIMIT = 32 * 1024 * 1024   # safe on v5e/v6e/v7x; per-step blocks are small


def _round_up(x, m):
    return (x + m - 1) // m * m


# -----------------------------------------------------------------------------
# Fused Pallas kernel: 1x1 expand -> 3x3 depthwise -> 1x1 project (+ residual)
# -----------------------------------------------------------------------------
def _fused_ir_kernel(*refs, expand, use_res, H, W, stride, mxu_dtype):
    """One batch image per grid step; hidden activation stays in VMEM.

    refs (expand=True):  x(1,H*W,inp), w_exp(inp,hp), b1(1,hp), w_dw(3,3,hp),
                         b2(1,1,hp), w_proj(hp,op), b3(1,op), o(1,Ho*Wo,op),
                         xpad scratch (H+2, W+2, hp).
    BN scales are pre-folded into the weights; only the bias add remains here.
    """
    if expand:
        (x_ref, w_exp_ref, b1_ref, w_dw_ref, b2_ref,
         w_proj_ref, b3_ref, o_ref, xpad_ref) = refs
    else:
        (x_ref, w_dw_ref, b2_ref, w_proj_ref, b3_ref, o_ref, xpad_ref) = refs

    hp = xpad_ref.shape[-1]
    op = o_ref.shape[-1]
    inp = x_ref.shape[-1]
    ho = (H - 1) // stride + 1
    wo = (W - 1) // stride + 1

    x2d = x_ref[0]                                   # (H*W, inp), act dtype

    # ---- stage 1: 1x1 expand matmul + BN bias + ReLU6, straight into the
    #      halo scratch (never written to HBM) ----
    if expand:
        h = jnp.dot(x2d, w_exp_ref[...], preferred_element_type=jnp.float32)
        h = jnp.clip(h + b1_ref[...], 0.0, 6.0)
        interior = h.astype(xpad_ref.dtype).reshape(H, W, hp)
    else:
        xin = x2d.astype(xpad_ref.dtype)
        if hp > inp:  # zero the padded lanes explicitly (scratch is uninit)
            xin = jnp.concatenate(
                [xin, jnp.zeros((H * W, hp - inp), xpad_ref.dtype)], axis=-1)
        interior = xin.reshape(H, W, hp)

    # Zero only the 1-pixel border of the halo scratch (not the whole block).
    zdt = xpad_ref.dtype
    zrow = jnp.zeros((1, W + 2, hp), zdt)
    zcol = jnp.zeros((H, 1, hp), zdt)
    xpad_ref[pl.ds(0, 1), :, :] = zrow
    xpad_ref[pl.ds(H + 1, 1), :, :] = zrow
    xpad_ref[pl.ds(1, H), pl.ds(0, 1), :] = zcol
    xpad_ref[pl.ds(1, H), pl.ds(W + 1, 1), :] = zcol
    xpad_ref[pl.ds(1, H), pl.ds(1, W), :] = interior

    # ---- stage 2: 3x3 depthwise (pad=1, stride 1 or 2) + BN bias + ReLU6 ----
    wdw = w_dw_ref[...]                              # f32, scale pre-folded
    acc = jnp.zeros((ho, wo, hp), jnp.float32)
    for kh in range(3):
        for kw in range(3):
            if stride == 1:
                tap = xpad_ref[pl.ds(kh, H), pl.ds(kw, W), :]
            else:
                tap = xpad_ref[pl.ds(kh, ho, stride), pl.ds(kw, wo, stride), :]
            acc = acc + tap.astype(jnp.float32) * wdw[kh, kw, :]
    hdw = jnp.clip(acc + b2_ref[...], 0.0, 6.0)

    # ---- stage 3: 1x1 project matmul + BN bias (+ fused residual add) ----
    h2d = hdw.reshape(ho * wo, hp).astype(mxu_dtype)
    out = jnp.dot(h2d, w_proj_ref[...], preferred_element_type=jnp.float32)
    out = out + b3_ref[...]
    if use_res:
        res = x2d.astype(jnp.float32)
        if op > inp:
            res = jnp.concatenate(
                [res, jnp.zeros((H * W, op - inp), jnp.float32)], axis=-1)
        out = out + res
    o_ref[0] = out.astype(o_ref.dtype)


# -----------------------------------------------------------------------------
# Parameters (deterministic, PyTorch-layout), BN folding, kernel-ready prep
# -----------------------------------------------------------------------------
def init_params(inp, oup, expand_ratio, key):
    hidden = int(round(inp * expand_ratio))
    it = iter(list(jax.random.split(key, 16)))

    def nrm(shape, scale=0.2):
        return scale * jax.random.normal(next(it), shape, dtype=jnp.float32)

    def bn(c):
        return dict(gamma=1.0 + nrm((c,), 0.1), beta=nrm((c,), 0.1),
                    mean=nrm((c,), 0.1), var=jnp.abs(nrm((c,), 0.1)) + 0.5)

    p = {"hidden": hidden, "expand": expand_ratio != 1}
    if expand_ratio != 1:
        p["w_exp"] = nrm((hidden, inp, 1, 1))     # OIHW
        p["bn1"] = bn(hidden)
    p["w_dw"] = nrm((hidden, 1, 3, 3))            # OIHW, groups=hidden
    p["bn2"] = bn(hidden)
    p["w_proj"] = nrm((oup, hidden, 1, 1))        # OIHW
    p["bn3"] = bn(oup)
    return p


def fold_bn(bn):
    scale = bn["gamma"] / jnp.sqrt(bn["var"] + EPS)
    bias = bn["beta"] - bn["mean"] * scale
    return scale, bias


def prepare_params(p, inp, oup, act_dtype=jnp.bfloat16):
    """One-time conversion to kernel-ready layout: transposes, BN folding
    (scale folded INTO the weights), pre-cast of pointwise weights to the MXU
    dtype, and zero-padding of channel dims to multiples of 128."""
    hidden = p["hidden"]
    hp = _round_up(hidden, LANE)
    op = _round_up(oup, LANE)

    def pad_last(a, n):
        return jnp.pad(a, [(0, 0)] * (a.ndim - 1) + [(0, n - a.shape[-1])])

    prep = {"hidden": hidden, "hp": hp, "op": op, "expand": p["expand"]}
    if p["expand"]:
        s1, b1 = fold_bn(p["bn1"])
        w = p["w_exp"][:, :, 0, 0].T * s1[None, :]               # (inp, hidden)
        prep["w_exp"] = pad_last(w, hp).astype(act_dtype)
        prep["b1"] = pad_last(b1[None, :], hp)                   # f32 epilogue
    s2, b2 = fold_bn(p["bn2"])
    wdw = jnp.transpose(p["w_dw"][:, 0, :, :], (1, 2, 0)) * s2[None, None, :]
    prep["w_dw"] = pad_last(wdw, hp)                             # keep f32
    prep["b2"] = pad_last(b2[None, None, :], hp)
    s3, b3 = fold_bn(p["bn3"])
    wp = p["w_proj"][:, :, 0, 0].T * s3[None, :]                 # (hidden, oup)
    prep["w_proj"] = jnp.pad(
        wp, ((0, hp - hidden), (0, op - oup))).astype(act_dtype)
    prep["b3"] = pad_last(b3[None, :], op)
    return prep


# -----------------------------------------------------------------------------
# Forward passes
# -----------------------------------------------------------------------------
def inverted_residual_forward(x_nchw, prep, inp, oup, stride, *,
                              act_dtype=jnp.bfloat16):
    """Pallas InvertedResidual forward. x: (N, inp, H, W) f32 -> (N, oup, Ho, Wo) f32.

    act_dtype sets the MXU operand dtype, the dtype of the in-VMEM hidden
    activation and the input cast (bf16 = performance config for v6e/v7x;
    f32 = exact float32 semantics and the right choice on v5e)."""
    N, _, H, W = x_nchw.shape
    hp, op = prep["hp"], prep["op"]
    expand = prep["expand"]
    use_res = (stride == 1) and (inp == oup)
    ho = (H - 1) // stride + 1
    wo = (W - 1) // stride + 1

    # NHWC + cast to act_dtype (cast fuses into the XLA transpose), flattened
    # to pixel rows so the kernel never reshapes the narrow-lane input.
    x2d = jnp.transpose(x_nchw, (0, 2, 3, 1)).astype(act_dtype).reshape(
        N, H * W, inp)

    kernel = functools.partial(
        _fused_ir_kernel, expand=expand, use_res=use_res,
        H=H, W=W, stride=stride, mxu_dtype=act_dtype)

    operands = [x2d]
    in_specs = [pl.BlockSpec((1, H * W, inp), lambda n: (n, 0, 0))]
    if expand:
        operands += [prep["w_exp"], prep["b1"]]
        in_specs += [pl.BlockSpec((inp, hp), lambda n: (0, 0)),
                     pl.BlockSpec((1, hp), lambda n: (0, 0))]
    operands += [prep["w_dw"], prep["b2"], prep["w_proj"], prep["b3"]]
    in_specs += [pl.BlockSpec((3, 3, hp), lambda n: (0, 0, 0)),
                 pl.BlockSpec((1, 1, hp), lambda n: (0, 0, 0)),
                 pl.BlockSpec((hp, op), lambda n: (0, 0)),
                 pl.BlockSpec((1, op), lambda n: (0, 0))]

    out2d = pl.pallas_call(
        kernel,
        out_shape=jax.ShapeDtypeStruct((N, ho * wo, op), jnp.float32),
        grid=(N,),
        in_specs=in_specs,
        out_specs=pl.BlockSpec((1, ho * wo, op), lambda n: (n, 0, 0)),
        scratch_shapes=[pltpu.VMEM((H + 2, W + 2, hp), act_dtype)],
        compiler_params=pltpu.CompilerParams(
            dimension_semantics=("parallel",),   # N>=2 -> both v7x TensorCores
            vmem_limit_bytes=VMEM_LIMIT),
    )(*operands)

    out = out2d.reshape(N, ho, wo, op)[..., :oup]    # drop lane padding
    return jnp.transpose(out, (0, 3, 1, 2))          # back to NCHW, f32


def ref_forward(x, p, inp, oup, stride, act_dtype=jnp.float32):
    """Pure-JAX (lax.conv) reference with folded-BN semantics, mirroring the
    kernel's precision model (scale folded into weights, f32 accumulation)."""
    hidden = p["hidden"]
    use_res = (stride == 1) and (inp == oup)
    dn = ("NCHW", "OIHW", "NCHW")
    xa = x.astype(act_dtype)

    h = xa
    if p["expand"]:
        s1, b1 = fold_bn(p["bn1"])
        w = (p["w_exp"] * s1[:, None, None, None]).astype(act_dtype)
        h = lax.conv_general_dilated(h, w, (1, 1), "VALID",
                                     dimension_numbers=dn,
                                     preferred_element_type=jnp.float32)
        h = jnp.clip(h + b1[None, :, None, None], 0.0, 6.0).astype(act_dtype)
    s2, b2 = fold_bn(p["bn2"])
    wdw = p["w_dw"] * s2[:, None, None, None]                      # f32
    h = lax.conv_general_dilated(h.astype(jnp.float32), wdw, (stride, stride),
                                 ((1, 1), (1, 1)), dimension_numbers=dn,
                                 feature_group_count=hidden,
                                 preferred_element_type=jnp.float32)
    h = jnp.clip(h + b2[None, :, None, None], 0.0, 6.0).astype(act_dtype)
    s3, b3 = fold_bn(p["bn3"])
    wp = (p["w_proj"] * s3[:, None, None, None]).astype(act_dtype)
    h = lax.conv_general_dilated(h, wp, (1, 1), "VALID",
                                 dimension_numbers=dn,
                                 preferred_element_type=jnp.float32)
    h = h + b3[None, :, None, None]
    if use_res:
        h = xa.astype(jnp.float32) + h
    return h


# -----------------------------------------------------------------------------
if __name__ == "__main__":
    key = jax.random.PRNGKey(0)
    kx, kp1, kp2, kp3 = jax.random.split(key, 4)

    x = jax.random.normal(kx, (2, 4, 16, 16), dtype=jnp.float32)

    cases = [
        (4, 4, 1, 6, kp1),   # stride=1, inp==oup -> residual, expand path
        (4, 8, 2, 6, kp2),   # stride=2, no residual
        (4, 4, 1, 1, kp3),   # expand_ratio=1 -> no expand conv, residual
    ]
    for inp, oup, stride, er, kp in cases:
        params = init_params(inp, oup, er, kp)
        Ho = (16 - 1) // stride + 1

        # exact float32 semantics
        prep32 = prepare_params(params, inp, oup, act_dtype=jnp.float32)
        out32 = jax.block_until_ready(
            inverted_residual_forward(x, prep32, inp, oup, stride,
                                      act_dtype=jnp.float32))
        ref32 = jax.block_until_ready(ref_forward(x, params, inp, oup, stride))
        assert out32.shape == (2, oup, Ho, Ho)
        assert jnp.allclose(out32, ref32, atol=1e-4, rtol=1e-4), "f32 mismatch"

        # performance configuration: bf16 MXU operands + bf16 in-VMEM hidden act
        prepbf = prepare_params(params, inp, oup, act_dtype=jnp.bfloat16)
        outbf = jax.block_until_ready(
            inverted_residual_forward(x, prepbf, inp, oup, stride,
                                      act_dtype=jnp.bfloat16))
        refbf = jax.block_until_ready(
            ref_forward(x, params, inp, oup, stride, act_dtype=jnp.bfloat16))
        assert outbf.shape == (2, oup, Ho, Ho)
        assert jnp.allclose(outbf, refbf, atol=1e-2, rtol=1e-2), "bf16 mismatch"

    print("KERNEL_OK")
</pallas_src>

<mosaic_0001>
module attributes {stable_mosaic.version = 11 : i64} {
  func.func @_fused_ir_kernel(%arg0: i32, %arg1: memref<1x256x4xf32, #tpu.memory_space<vmem>>, %arg2: memref<4x128xf32, #tpu.memory_space<vmem>>, %arg3: memref<1x128xf32, #tpu.memory_space<vmem>>, %arg4: memref<3x3x128xf32, #tpu.memory_space<vmem>>, %arg5: memref<1x1x128xf32, #tpu.memory_space<vmem>>, %arg6: memref<128x128xf32, #tpu.memory_space<vmem>>, %arg7: memref<1x128xf32, #tpu.memory_space<vmem>>, %arg8: memref<1x256x128xf32, #tpu.memory_space<vmem>>, %arg9: memref<18x18x128xf32, #tpu.memory_space<vmem>>) attributes {dimension_semantics = [#tpu.dimension_semantics<parallel>], iteration_bounds = array<i64: 2>, scalar_prefetch = 0 : i64, scratch_operands = 1 : i64, tpu.core_type = #tpu.core_type<tc>, window_params = [{transform_indices = @transform_0, window_bounds = array<i64: 1, 256, 4>}, {pipeline_mode = #tpu.pipeline_mode<synchronous>, transform_indices = @transform_1, window_bounds = array<i64: 4, 128>}, {pipeline_mode = #tpu.pipeline_mode<synchronous>, transform_indices = @transform_2, window_bounds = array<i64: 1, 128>}, {pipeline_mode = #tpu.pipeline_mode<synchronous>, transform_indices = @transform_3, window_bounds = array<i64: 3, 3, 128>}, {pipeline_mode = #tpu.pipeline_mode<synchronous>, transform_indices = @transform_4, window_bounds = array<i64: 1, 1, 128>}, {pipeline_mode = #tpu.pipeline_mode<synchronous>, transform_indices = @transform_5, window_bounds = array<i64: 128, 128>}, {pipeline_mode = #tpu.pipeline_mode<synchronous>, transform_indices = @transform_6, window_bounds = array<i64: 1, 128>}, {transform_indices = @transform_7, window_bounds = array<i64: 1, 256, 128>}]} {
    %c0 = arith.constant 0 : index
    %c0_0 = arith.constant 0 : index
    %c0_1 = arith.constant 0 : index
    %0 = vector.load %arg1[%c0, %c0_0, %c0_1] : memref<1x256x4xf32, #tpu.memory_space<vmem>>, vector<1x256x4xf32>
    %1 = vector.shape_cast %0 : vector<1x256x4xf32> to vector<256x4xf32>
    %c0_2 = arith.constant 0 : index
    %c0_3 = arith.constant 0 : index
    %2 = vector.load %arg2[%c0_2, %c0_3] : memref<4x128xf32, #tpu.memory_space<vmem>>, vector<4x128xf32>
    %cst = arith.constant dense<0.000000e+00> : vector<256x128xf32>
    %3 = tpu.matmul %1, %2, %cst {dimension_numbers = #tpu.dot_dimension_numbers<[1], [0], [0], [1], [0, 0, 1, 1], [], []>} : vector<256x4xf32>, vector<4x128xf32>, vector<256x128xf32> -> vector<256x128xf32>
    %c0_4 = arith.constant 0 : index
    %c0_5 = arith.constant 0 : index
    %4 = vector.load %arg3[%c0_4, %c0_5] : memref<1x128xf32, #tpu.memory_space<vmem>>, vector<1x128xf32>
    %5 = vector.broadcast %4 : vector<1x128xf32> to vector<256x128xf32>
    %6 = arith.addf %3, %5 : vector<256x128xf32>
    %cst_6 = arith.constant 0.000000e+00 : f32
    %cst_7 = arith.constant 6.000000e+00 : f32
    %7 = vector.broadcast %cst_6 : f32 to vector<256x128xf32>
    %8 = arith.maximumf %7, %6 : vector<256x128xf32>
    %9 = vector.broadcast %cst_7 : f32 to vector<256x128xf32>
    %10 = arith.minimumf %9, %8 : vector<256x128xf32>
    %11 = vector.shape_cast %10 : vector<256x128xf32> to vector<16x16x128xf32>
    %cst_8 = arith.constant 0.000000e+00 : f32
    %12 = vector.broadcast %cst_8 : f32 to vector<1x18x128xf32>
    %cst_9 = arith.constant 0.000000e+00 : f32
    %13 = vector.broadcast %cst_9 : f32 to vector<16x1x128xf32>
    %c0_10 = arith.constant 0 : index
    %c0_11 = arith.constant 0 : index
    %c0_12 = arith.constant 0 : index
    %14 = vector.load %arg9[%c0_10, %c0_11, %c0_12] : memref<18x18x128xf32, #tpu.memory_space<vmem>>, vector<1x18x128xf32>
    tpu.vector_store %arg9[%c0_10, %c0_11, %c0_12], %12 {strides = array<i32>} : memref<18x18x128xf32, #tpu.memory_space<vmem>>, vector<1x18x128xf32>,
    %c17 = arith.constant 17 : index
    %c0_13 = arith.constant 0 : index
    %c0_14 = arith.constant 0 : index
    %15 = vector.load %arg9[%c17, %c0_13, %c0_14] : memref<18x18x128xf32, #tpu.memory_space<vmem>>, vector<1x18x128xf32>
    tpu.vector_store %arg9[%c17, %c0_13, %c0_14], %12 {strides = array<i32>} : memref<18x18x128xf32, #tpu.memory_space<vmem>>, vector<1x18x128xf32>,
    %c1 = arith.constant 1 : index
    %c0_15 = arith.constant 0 : index
    %c0_16 = arith.constant 0 : index
    %16 = vector.load %arg9[%c1, %c0_15, %c0_16] : memref<18x18x128xf32, #tpu.memory_space<vmem>>, vector<16x1x128xf32>
    tpu.vector_store %arg9[%c1, %c0_15, %c0_16], %13 {strides = array<i32>} : memref<18x18x128xf32, #tpu.memory_space<vmem>>, vector<16x1x128xf32>,
    %c1_17 = arith.constant 1 : index
    %c17_18 = arith.constant 17 : index
    %c0_19 = arith.constant 0 : index
    %17 = vector.load %arg9[%c1_17, %c17_18, %c0_19] : memref<18x18x128xf32, #tpu.memory_space<vmem>>, vector<16x1x128xf32>
    tpu.vector_store %arg9[%c1_17, %c17_18, %c0_19], %13 {strides = array<i32>} : memref<18x18x128xf32, #tpu.memory_space<vmem>>, vector<16x1x128xf32>,
    %c1_20 = arith.constant 1 : index
    %c1_21 = arith.constant 1 : index
    %c0_22 = arith.constant 0 : index
    %18 = vector.load %arg9[%c1_20, %c1_21, %c0_22] : memref<18x18x128xf32, #tpu.memory_space<vmem>>, vector<16x16x128xf32>
    tpu.vector_store %arg9[%c1_20, %c1_21, %c0_22], %11 {strides = array<i32>} : memref<18x18x128xf32, #tpu.memory_space<vmem>>, vector<16x16x128xf32>,
    %c0_23 = arith.constant 0 : index
    %c0_24 = arith.constant 0 : index
    %c0_25 = arith.constant 0 : index
    %19 = vector.load %arg4[%c0_23, %c0_24, %c0_25] : memref<3x3x128xf32, #tpu.memory_space<vmem>>, vector<3x3x128xf32>
    %cst_26 = arith.constant 0.000000e+00 : f32
    %20 = vector.broadcast %cst_26 : f32 to vector<16x16x128xf32>
    %c0_27 = arith.constant 0 : index
    %c0_28 = arith.constant 0 : index
    %c0_29 = arith.constant 0 : index
    %21 = vector.load %arg9[%c0_27, %c0_28, %c0_29] : memref<18x18x128xf32, #tpu.memory_space<vmem>>, vector<16x16x128xf32>
    %22 = vector.extract_strided_slice %19 {offsets = [0, 0, 0], sizes = [1, 1, 128], strides = [1, 1, 1]} : vector<3x3x128xf32> to vector<1x1x128xf32>
    %23 = vector.shape_cast %22 : vector<1x1x128xf32> to vector<128xf32>
    %24 = vector.shape_cast %23 : vector<128xf32> to vector<1x1x128xf32>
    %25 = vector.broadcast %24 : vector<1x1x128xf32> to vector<16x16x128xf32>
    %26 = arith.mulf %21, %25 : vector<16x16x128xf32>
    %27 = arith.addf %20, %26 : vector<16x16x128xf32>
    %c0_30 = arith.constant 0 : index
    %c1_31 = arith.constant 1 : index
    %c0_32 = arith.constant 0 : index
    %28 = vector.load %arg9[%c0_30, %c1_31, %c0_32] : memref<18x18x128xf32, #tpu.memory_space<vmem>>, vector<16x16x128xf32>
    %29 = vector.extract_strided_slice %19 {offsets = [0, 1, 0], sizes = [1, 1, 128], strides = [1, 1, 1]} : vector<3x3x128xf32> to vector<1x1x128xf32>
    %30 = vector.shape_cast %29 : vector<1x1x128xf32> to vector<128xf32>
    %31 = vector.shape_cast %30 : vector<128xf32> to vector<1x1x128xf32>
    %32 = vector.broadcast %31 : vector<1x1x128xf32> to vector<16x16x128xf32>
    %33 = arith.mulf %28, %32 : vector<16x16x128xf32>
    %34 = arith.addf %27, %33 : vector<16x16x128xf32>
    %c0_33 = arith.constant 0 : index
    %c2 = arith.constant 2 : index
    %c0_34 = arith.constant 0 : index
    %35 = vector.load %arg9[%c0_33, %c2, %c0_34] : memref<18x18x128xf32, #tpu.memory_space<vmem>>, vector<16x16x128xf32>
    %36 = vector.extract_strided_slice %19 {offsets = [0, 2, 0], sizes = [1, 1, 128], strides = [1, 1, 1]} : vector<3x3x128xf32> to vector<1x1x128xf32>
    %37 = vector.shape_cast %36 : vector<1x1x128xf32> to vector<128xf32>
    %38 = vector.shape_cast %37 : vector<128xf32> to vector<1x1x128xf32>
    %39 = vector.broadcast %38 : vector<1x1x128xf32> to vector<16x16x128xf32>
    %40 = arith.mulf %35, %39 : vector<16x16x128xf32>
    %41 = arith.addf %34, %40 : vector<16x16x128xf32>
    %c1_35 = arith.constant 1 : index
    %c0_36 = arith.constant 0 : index
    %c0_37 = arith.constant 0 : index
    %42 = vector.load %arg9[%c1_35, %c0_36, %c0_37] : memref<18x18x128xf32, #tpu.memory_space<vmem>>, vector<16x16x128xf32>
    %43 = vector.extract_strided_slice %19 {offsets = [1, 0, 0], sizes = [1, 1, 128], strides = [1, 1, 1]} : vector<3x3x128xf32> to vector<1x1x128xf32>
    %44 = vector.shape_cast %43 : vector<1x1x128xf32> to vector<128xf32>
    %45 = vector.shape_cast %44 : vector<128xf32> to vector<1x1x128xf32>
    %46 = vector.broadcast %45 : vector<1x1x128xf32> to vector<16x16x128xf32>
    %47 = arith.mulf %42, %46 : vector<16x16x128xf32>
    %48 = arith.addf %41, %47 : vector<16x16x128xf32>
    %c1_38 = arith.constant 1 : index
    %c1_39 = arith.constant 1 : index
    %c0_40 = arith.constant 0 : index
    %49 = vector.load %arg9[%c1_38, %c1_39, %c0_40] : memref<18x18x128xf32, #tpu.memory_space<vmem>>, vector<16x16x128xf32>
    %50 = vector.extract_strided_slice %19 {offsets = [1, 1, 0], sizes = [1, 1, 128], strides = [1, 1, 1]} : vector<3x3x128xf32> to vector<1x1x128xf32>
    %51 = vector.shape_cast %50 : vector<1x1x128xf32> to vector<128xf32>
    %52 = vector.shape_cast %51 : vector<128xf32> to vector<1x1x128xf32>
    %53 = vector.broadcast %52 : vector<1x1x128xf32> to vector<16x16x128xf32>
    %54 = arith.mulf %49, %53 : vector<16x16x128xf32>
    %55 = arith.addf %48, %54 : vector<16x16x128xf32>
    %c1_41 = arith.constant 1 : index
    %c2_42 = arith.constant 2 : index
    %c0_43 = arith.constant 0 : index
    %56 = vector.load %arg9[%c1_41, %c2_42, %c0_43] : memref<18x18x128xf32, #tpu.memory_space<vmem>>, vector<16x16x128xf32>
    %57 = vector.extract_strided_slice %19 {offsets = [1, 2, 0], sizes = [1, 1, 128], strides = [1, 1, 1]} : vector<3x3x128xf32> to vector<1x1x128xf32>
    %58 = vector.shape_cast %57 : vector<1x1x128xf32> to vector<128xf32>
    %59 = vector.shape_cast %58 : vector<128xf32> to vector<1x1x128xf32>
    %60 = vector.broadcast %59 : vector<1x1x128xf32> to vector<16x16x128xf32>
    %61 = arith.mulf %56, %60 : vector<16x16x128xf32>
    %62 = arith.addf %55, %61 : vector<16x16x128xf32>
    %c2_44 = arith.constant 2 : index
    %c0_45 = arith.constant 0 : index
    %c0_46 = arith.constant 0 : index
    %63 = vector.load %arg9[%c2_44, %c0_45, %c0_46] : memref<18x18x128xf32, #tpu.memory_space<vmem>>, vector<16x16x128xf32>
    %64 = vector.extract_strided_slice %19 {offsets = [2, 0, 0], sizes = [1, 1, 128], strides = [1, 1, 1]} : vector<3x3x128xf32> to vector<1x1x128xf32>
    %65 = vector.shape_cast %64 : vector<1x1x128xf32> to vector<128xf32>
    %66 = vector.shape_cast %65 : vector<128xf32> to vector<1x1x128xf32>
    %67 = vector.broadcast %66 : vector<1x1x128xf32> to vector<16x16x128xf32>
    %68 = arith.mulf %63, %67 : vector<16x16x128xf32>
    %69 = arith.addf %62, %68 : vector<16x16x128xf32>
    %c2_47 = arith.constant 2 : index
    %c1_48 = arith.constant 1 : index
    %c0_49 = arith.constant 0 : index
    %70 = vector.load %arg9[%c2_47, %c1_48, %c0_49] : memref<18x18x128xf32, #tpu.memory_space<vmem>>, vector<16x16x128xf32>
    %71 = vector.extract_strided_slice %19 {offsets = [2, 1, 0], sizes = [1, 1, 128], strides = [1, 1, 1]} : vector<3x3x128xf32> to vector<1x1x128xf32>
    %72 = vector.shape_cast %71 : vector<1x1x128xf32> to vector<128xf32>
    %73 = vector.shape_cast %72 : vector<128xf32> to vector<1x1x128xf32>
    %74 = vector.broadcast %73 : vector<1x1x128xf32> to vector<16x16x128xf32>
    %75 = arith.mulf %70, %74 : vector<16x16x128xf32>
    %76 = arith.addf %69, %75 : vector<16x16x128xf32>
    %c2_50 = arith.constant 2 : index
    %c2_51 = arith.constant 2 : index
    %c0_52 = arith.constant 0 : index
    %77 = vector.load %arg9[%c2_50, %c2_51, %c0_52] : memref<18x18x128xf32, #tpu.memory_space<vmem>>, vector<16x16x128xf32>
    %78 = vector.extract_strided_slice %19 {offsets = [2, 2, 0], sizes = [1, 1, 128], strides = [1, 1, 1]} : vector<3x3x128xf32> to vector<1x1x128xf32>
    %79 = vector.shape_cast %78 : vector<1x1x128xf32> to vector<128xf32>
    %80 = vector.shape_cast %79 : vector<128xf32> to vector<1x1x128xf32>
    %81 = vector.broadcast %80 : vector<1x1x128xf32> to vector<16x16x128xf32>
    %82 = arith.mulf %77, %81 : vector<16x16x128xf32>
    %83 = arith.addf %76, %82 : vector<16x16x128xf32>
    %c0_53 = arith.constant 0 : index
    %c0_54 = arith.constant 0 : index
    %c0_55 = arith.constant 0 : index
    %84 = vector.load %arg5[%c0_53, %c0_54, %c0_55] : memref<1x1x128xf32, #tpu.memory_space<vmem>>, vector<1x1x128xf32>
    %85 = vector.broadcast %84 : vector<1x1x128xf32> to vector<16x16x128xf32>
    %86 = arith.addf %83, %85 : vector<16x16x128xf32>
    %cst_56 = arith.constant 0.000000e+00 : f32
    %cst_57 = arith.constant 6.000000e+00 : f32
    %87 = vector.broadcast %cst_56 : f32 to vector<16x16x128xf32>
    %88 = arith.maximumf %87, %86 : vector<16x16x128xf32>
    %89 = vector.broadcast %cst_57 : f32 to vector<16x16x128xf32>
    %90 = arith.minimumf %89, %88 : vector<16x16x128xf32>
    %91 = vector.shape_cast %90 : vector<16x16x128xf32> to vector<256x128xf32>
    %c0_58 = arith.constant 0 : index
    %c0_59 = arith.constant 0 : index
    %92 = vector.load %arg6[%c0_58, %c0_59] : memref<128x128xf32, #tpu.memory_space<vmem>>, vector<128x128xf32>
    %cst_60 = arith.constant dense<0.000000e+00> : vector<256x128xf32>
    %93 = tpu.matmul %91, %92, %cst_60 {dimension_numbers = #tpu.dot_dimension_numbers<[1], [0], [0], [1], [0, 0, 1, 1], [], []>} : vector<256x128xf32>, vector<128x128xf32>, vector<256x128xf32> -> vector<256x128xf32>
    %c0_61 = arith.constant 0 : index
    %c0_62 = arith.constant 0 : index
    %94 = vector.load %arg7[%c0_61, %c0_62] : memref<1x128xf32, #tpu.memory_space<vmem>>, vector<1x128xf32>
    %95 = vector.broadcast %94 : vector<1x128xf32> to vector<256x128xf32>
    %96 = arith.addf %93, %95 : vector<256x128xf32>
    %cst_63 = arith.constant 0.000000e+00 : f32
    %97 = vector.broadcast %cst_63 : f32 to vector<256x124xf32>
    %98 = tpu.concatenate %1, %97 in 1 : vector<256x4xf32>, vector<256x124xf32> -> vector<256x128xf32>
    %99 = arith.addf %96, %98 : vector<256x128xf32>
    %c0_64 = arith.constant 0 : index
    %c0_65 = arith.constant 0 : index
    %c0_66 = arith.constant 0 : index
    %100 = vector.load %arg8[%c0_64, %c0_65, %c0_66] : memref<1x256x128xf32, #tpu.memory_space<vmem>>, vector<1x256x128xf32>
    %101 = vector.shape_cast %100 : vector<1x256x128xf32> to vector<256x128xf32>
    %102 = vector.shape_cast %99 : vector<256x128xf32> to vector<1x256x128xf32>
    tpu.vector_store %arg8[%c0_64, %c0_65, %c0_66], %102 {strides = array<i32>} : memref<1x256x128xf32, #tpu.memory_space<vmem>>, vector<1x256x128xf32>,
    return
  }
  func.func @transform_0(%arg0: i32) -> (i32, i32, i32) {
    %c0_i32 = arith.constant 0 : i32
    %c0_i32_0 = arith.constant 0 : i32
    %c0_i32_1 = arith.constant 0 : i32
    return %arg0, %c0_i32, %c0_i32_0 : i32, i32, i32
  }
  func.func @transform_1(%arg0: i32) -> (i32, i32) {
    %c0_i32 = arith.constant 0 : i32
    %c0_i32_0 = arith.constant 0 : i32
    %c0_i32_1 = arith.constant 0 : i32
    return %c0_i32, %c0_i32_0 : i32, i32
  }
  func.func @transform_2(%arg0: i32) -> (i32, i32) {
    %c0_i32 = arith.constant 0 : i32
    %c0_i32_0 = arith.constant 0 : i32
    %c0_i32_1 = arith.constant 0 : i32
    return %c0_i32, %c0_i32_0 : i32, i32
  }
  func.func @transform_3(%arg0: i32) -> (i32, i32, i32) {
    %c0_i32 = arith.constant 0 : i32
    %c0_i32_0 = arith.constant 0 : i32
    %c0_i32_1 = arith.constant 0 : i32
    %c0_i32_2 = arith.constant 0 : i32
    return %c0_i32, %c0_i32_0, %c0_i32_1 : i32, i32, i32
  }
  func.func @transform_4(%arg0: i32) -> (i32, i32, i32) {
    %c0_i32 = arith.constant 0 : i32
    %c0_i32_0 = arith.constant 0 : i32
    %c0_i32_1 = arith.constant 0 : i32
    %c0_i32_2 = arith.constant 0 : i32
    return %c0_i32, %c0_i32_0, %c0_i32_1 : i32, i32, i32
  }
  func.func @transform_5(%arg0: i32) -> (i32, i32) {
    %c0_i32 = arith.constant 0 : i32
    %c0_i32_0 = arith.constant 0 : i32
    %c0_i32_1 = arith.constant 0 : i32
    return %c0_i32, %c0_i32_0 : i32, i32
  }
  func.func @transform_6(%arg0: i32) -> (i32, i32) {
    %c0_i32 = arith.constant 0 : i32
    %c0_i32_0 = arith.constant 0 : i32
    %c0_i32_1 = arith.constant 0 : i32
    return %c0_i32, %c0_i32_0 : i32, i32
  }
  func.func @transform_7(%arg0: i32) -> (i32, i32, i32) {
    %c0_i32 = arith.constant 0 : i32
    %c0_i32_0 = arith.constant 0 : i32
    %c0_i32_1 = arith.constant 0 : i32
    return %arg0, %c0_i32, %c0_i32_0 : i32, i32, i32
  }
}

</mosaic_0001>

<bundles_post_ra>
// kernel: tpu_custom_call.1
= control target key start
LH: loop header
LB: loop body
LE: loop exit
PB: predicated region body
PF: predicated region fallthrough
CT: control target
= control target key end

     0   :  { %12 = vsyncpa [#allocation4], 0  ;;  %s3906_s0 = inlined_call_operand.vmem [shape: f32[2,256,4], index: 0, kind: input, shape index: {}]   ;;  %s3907_s1 = inlined_call_operand.vmem [shape: f32[4,128], index: 1, kind: input, shape index: {}]   ;;  %s3908_s2 = inlined_call_operand.vmem [shape: f32[1,128], index: 2, kind: input, shape index: {}]   ;;  %s3909_s3 = inlined_call_operand.vmem [shape: f32[3,3,128], index: 3, kind: input, shape index: {}]   ;;  %s3910_s4 = inlined_call_operand.vmem [shape: f32[1,1,128], index: 4, kind: input, shape index: {}]   ;;  %s3911_s5 = inlined_call_operand.vmem [shape: f32[128,128], index: 5, kind: input, shape index: {}]   ;;  %s3912_s6 = inlined_call_operand.vmem [shape: f32[1,128], index: 6, kind: input, shape index: {}]   ;;  %s3913_s7 = inlined_call_operand.hbm [shape: f32[2,256,128], index: 7, kind: output, shape index: {}]  }
   0x1   :  { %14 = vsyncpa [#allocation4 + $0x1], 0  ;;  %s2699_s24 = smov 0   ;;  %s2701_s25 = smov 0  }
   0x2   :  { %s2703_s26 = smov 0   ;;  %s2705_s27 = smov 0  }
   0x3 LB: > { %s2720_s28 = sadd.s32 4294967295, %s2653_s27   ;;  %s2206_s29 = sadd.s32 4294967294, %s2653_s27   ;;  %s2653_s27 = sphi %s2705_s27, %s3919_s27   ;;  %s2649_s26 = sphi %s2703_s26, %s3918_s26   ;;  %s2645_s25 = sphi %s2701_s25, %s3917_s25   ;;  %s2641_s24 = sphi %s2699_s24, %s3916_s24  }
   0x4   : > { %s2724_s30 = sadd.s32 1, %s2653_s27   ;;  %s179_s8 = sadd.s32 1, %s2649_s26 }
   0x5   : > { %s176_s9 = ssub.s32 %s2653_s27, %s2724_s30  ;;  %p189_p0 = scmp.ne.s32.totalorder %s2649_s26, %s2645_s25 }
   0x6   : > { %p177_p1 = scmp.eq.s32.totalorder %s176_s9, 0  ;;  %p190_p2 = scmp.eq.s32.totalorder %s2720_s28, 1 }
   0x7   : > { %p195_p3 = scmp.ne.s32.totalorder %s2645_s25, %s2641_s24  ;;  %p196_p4 = scmp.eq.s32.totalorder %s2206_s29, 1 }
   0x8   : > { %s2735_s10 = scalar_select %p177_p1, %s2649_s26, %s179_s8  }
   0x9   : > { %p2737_p5 = por %p190_p2, %p189_p0  ;;  %p2741_p6 = por %p196_p4, %p195_p3 }
   0xa   : > { %p2209_p7 = scmp.ge.s32.totalorder %s2653_s27, 1  ;;  %p240_p8 = scmp.lt.s32.totalorder %s2653_s27, 3 }
   0xc   : > { %p241_p9 = pnand %p2209_p7, %p240_p8 }
   0xd   : > { %v309_v0 = vld [vmem:[%s3907_s1] sm:$0xf] (!%p241_p9)  ;;  %vm414_vm0 = vcmask (!%p241_p9), 1043456   ;;  %p272_p10 = scmp.lt.s32.totalorder (!%p241_p9), %s2720_s28, 1  ;;  %vm317_vm1 = vcmask (!%p241_p9), 31744   ;;  %v1787_v34 = vld [vmem:[%s3911_s5 + $0x8] sm:$0xff] (!%p241_p9)  ;;  %v814_v58 = vlaneseq (!%p241_p9) }
   0xe   : > { %244 = sbr.rel (%p241_p9) target bundleno = 672 (0x2a0), region = 48  ;;  %2337 = vmatprep.subr.msk.mxu0 (!%p241_p9), %vm414_vm0, %v309_v0  ;;  %v1786_v33 = vld [vmem:[%s3911_s5] sm:$0xff] (!%p241_p9)  ;;  %v2655_v36 = vmov (!%p241_p9), 0.0   ;;  %v1788_v37 = vld [vmem:[%s3911_s5 + $0x10] sm:$0xff] (!%p241_p9)  ;;  %v1789_v38 = vld [vmem:[%s3911_s5 + $0x18] sm:$0xff] (!%p241_p9)  ;;  %s269_s8 = sand.u32 (!%p241_p9), 1, %s2645_s25  }
   0xf   : > { %2338 = vmatpush3.msk.msra.mxu0 (!%p241_p9), %vm414_vm0, %v309_v0  ;;  %v2467_v35 = vpack.c.bf16 (!%p241_p9), %v1787_v34, %v1786_v33  ;;  %707 = vst [vmem:[#allocation2] sm:$0xff] (!%p241_p9), %v2655_v36  ;;  %708 = vst [vmem:[#allocation2 + $0x8] sm:$0xff] (!%p241_p9), %v2655_v36  ;;  %v2471_v39 = vpack.c.bf16 (!%p241_p9), %v1789_v38, %v1788_v37  ;;  %v1790_v40 = vld [vmem:[%s3911_s5 + $0x20] sm:$0xff] (!%p241_p9)  ;;  %v1791_v41 = vld [vmem:[%s3911_s5 + $0x28] sm:$0xff] (!%p241_p9)  ;;  %v815_v59 = vshrl.u32 (!%p241_p9), %v814_v58, 7  ;;  %s2210_s14 = sshll.u32 (!%p241_p9), %s269_s8, 8 }
  0x10   : > { %715 = vst [vmem:[#allocation2 + $0x18] sm:$0x1] (!%p241_p9), %v2655_v36  ;;  %716 = vst [vmem:[#allocation2 + $0x30] sm:$0x1] (!%p241_p9), %v2655_v36  ;;  %v2475_v42 = vpack.c.bf16 (!%p241_p9), %v1791_v41, %v1790_v40  ;;  %v1792_v43 = vld [vmem:[%s3911_s5 + $0x30] sm:$0xff] (!%p241_p9)  ;;  %v1793_v44 = vld [vmem:[%s3911_s5 + $0x38] sm:$0xff] (!%p241_p9) }
  0x11   : > { %709 = vst [vmem:[#allocation2 + $0x10] sm:$0x3] (!%p241_p9), %v2655_v36  ;;  %711 = vst [vmem:[#allocation2 + $0x198] sm:$0xff] (!%p241_p9), %v2655_v36  ;;  %2468 = vmatprep.subr.bf16.mxu0 (!%p241_p9), %v2467_v35  ;;  %2499 = vmatprep.subr.bf16.mxu1 (!%p241_p9), %v2467_v35  ;;  %v2479_v45 = vpack.c.bf16 (!%p241_p9), %v1793_v44, %v1792_v43  ;;  %v1794_v46 = vld [vmem:[%s3911_s5 + $0x40] sm:$0xff] (!%p241_p9)  ;;  %v1795_v47 = vld [vmem:[%s3911_s5 + $0x48] sm:$0xff] (!%p241_p9)  ;;  %v816_v60 = vsub.s32 (!%p241_p9), 0, %v815_v59 }
  0x12   : > { %712 = vst [vmem:[#allocation2 + $0x1a0] sm:$0xff] (!%p241_p9), %v2655_v36  ;;  %713 = vst [vmem:[#allocation2 + $0x1a8] sm:$0x3] (!%p241_p9), %v2655_v36  ;;  %2507 = vmatpush3.bf16.msra.mxu1 (!%p241_p9), %v2467_v35  ;;  %v2483_v48 = vpack.c.bf16 (!%p241_p9), %v1795_v47, %v1794_v46  ;;  %v1796_v49 = vld [vmem:[%s3911_s5 + $0x50] sm:$0xff] (!%p241_p9)  ;;  %v1797_v50 = vld [vmem:[%s3911_s5 + $0x58] sm:$0xff] (!%p241_p9)  ;;  %v916_v61 = vsub.s32 (!%p241_p9), 1, %v815_v59 }
  0x13   : > { %717 = vst [vmem:[#allocation2 + $0x48] sm:$0x1] (!%p241_p9), %v2655_v36  ;;  %718 = vst [vmem:[#allocation2 + $0x60] sm:$0x1] (!%p241_p9), %v2655_v36  ;;  %2500 = vmatprep.subr.bf16.mxu1 (!%p241_p9), %v2471_v39  ;;  %v2487_v51 = vpack.c.bf16 (!%p241_p9), %v1797_v50, %v1796_v49  ;;  %v1798_v52 = vld [vmem:[%s3911_s5 + $0x60] sm:$0xff] (!%p241_p9)  ;;  %v1799_v53 = vld [vmem:[%s3911_s5 + $0x68] sm:$0xff] (!%p241_p9) }
  0x14   : > { %719 = vst [vmem:[#allocation2 + $0x78] sm:$0x1] (!%p241_p9), %v2655_v36  ;;  %720 = vst [vmem:[#allocation2 + $0x90] sm:$0x1] (!%p241_p9), %v2655_v36  ;;  %v2491_v54 = vpack.c.bf16 (!%p241_p9), %v1799_v53, %v1798_v52  ;;  %v1800_v55 = vld [vmem:[%s3911_s5 + $0x70] sm:$0xff] (!%p241_p9)  ;;  %v1801_v56 = vld [vmem:[%s3911_s5 + $0x78] sm:$0xff] (!%p241_p9) }
  0x15   : > { %s273_s15 = scalar_select %p272_p10, %s2720_s28, 1  ;;  %721 = vst [vmem:[#allocation2 + $0xa8] sm:$0x1] %v2655_v36  ;;  %722 = vst [vmem:[#allocation2 + $0xc0] sm:$0x1] %v2655_v36  ;;  %v2495_v57 = vpack.c.bf16 %v1801_v56, %v1800_v55 }
  0x16   : > { %723 = vst [vmem:[#allocation2 + $0xd8] sm:$0x1] %v2655_v36  ;;  %724 = vst [vmem:[#allocation2 + $0xf0] sm:$0x1] %v2655_v36  ;;  %2508 = vmatpush3.bf16.msra.mxu1 %v2471_v39  ;;  %v779_v62 = vld [vmem:[%s3909_s3] sm:$0x7] }
  0x17   : > { %s2254_s16 = sshll.u32 %s273_s15, 8  ;;  %725 = vst [vmem:[#allocation2 + $0x108] sm:$0x1] %v2655_v36  ;;  %726 = vst [vmem:[#allocation2 + $0x120] sm:$0x1] %v2655_v36  ;;  %2501 = vmatprep.subr.bf16.mxu1 %v2475_v42  ;;  %v2877_v0 = vrot.slane %v779_v62, %v816_v60  ;;  %s3730_s15 = scalar_lea.vmem [#allocation3], %s2210_s14 }
  0x18   : > { %s2755_s19 = scalar_lea.vmem %s3906_s0, %s2254_s16  ;;  %727 = vst [vmem:[#allocation2 + $0x138] sm:$0x1] %v2655_v36  ;;  %728 = vst [vmem:[#allocation2 + $0x150] sm:$0x1] %v2655_v36  ;;  %v2875_v63 = vld [vmem:[%s3908_s2] ss:$0 sm:$0xff] }
  0x19   : > { %v277_v1 = vld [vmem:[%s2755_s19] sm:$0xff]  ;;  %v278_v2 = vld [vmem:[%s2755_s19 + $0x8] sm:$0xff]  ;;  %v279_v3 = vld [vmem:[%s2755_s19 + $0x10] sm:$0xff]  ;;  %729 = vst [vmem:[#allocation2 + $0x168] sm:$0x1] %v2655_v36  ;;  %s2255_s16 = sshll.u32 %s2720_s28, 12 }
  0x1a   : > { %2339 = vmatprep.mubr.msk.f32.mxu0 %vm317_vm1, %v277_v1  ;;  %v280_v4 = vld [vmem:[%s2755_s19 + $0x18] sm:$0xff]  ;;  %v281_v5 = vld [vmem:[%s2755_s19 + $0x20] sm:$0xff]  ;;  %v282_v6 = vld [vmem:[%s2755_s19 + $0x28] sm:$0xff]  ;;  %730 = vst [vmem:[#allocation2 + $0x180] sm:$0x1] %v2655_v36  ;;  %2509 = vmatpush3.bf16.msra.mxu1 %v2475_v42  ;;  %v1016_v1 = vsub.s32 2, %v815_v59  ;;  %s3857_s21 = scalar_lea.hbm %s3913_s7, %s2255_s16 }
  0x1b   : > { %2340 = vmatmul.mubr.msk.f32.vlgmr.msra.gmra.mrb[0].mxu0 %vm317_vm1, %v278_v2  ;;  %v283_v7 = vld [vmem:[%s2755_s19 + $0x30] sm:$0xff]  ;;  %v284_v8 = vld [vmem:[%s2755_s19 + $0x38] sm:$0xff]  ;;  %v285_v9 = vld [vmem:[%s2755_s19 + $0x40] sm:$0xff]  ;;  %731 = vst [vmem:[#allocation2 + $0x29] sm:$0x1] %v2655_v36  ;;  %2502 = vmatprep.subr.bf16.mxu1 %v2479_v45  ;;  %s2144_s17 = sshll.u32 %s3730_s15, 4  ;;  %s3859_s17 = int_to_ptr.vmem [resolvable:$true] %s2144_s17 }
  0x1c   : > { %2342 = vmatprep.mubr.msk.f32.mxu0 %vm317_vm1, %v279_v3  ;;  %v286_v10 = vld [vmem:[%s2755_s19 + $0x48] sm:$0xff]  ;;  %v287_v11 = vld [vmem:[%s2755_s19 + $0x50] sm:$0xff]  ;;  %v288_v12 = vld [vmem:[%s2755_s19 + $0x58] sm:$0xff]  ;;  %732 = vst [vmem:[#allocation2 + $0x41] sm:$0x1] %v2655_v36  ;;  %2470 = vmatpush3.bf16.msra.mxu0 %v2467_v35  ;;  %s3865_s28 = scalar_lea.sflag [#allocation4], %s269_s8 }
  0x1d   : > { %v289_v13 = vld [vmem:[%s2755_s19 + $0x60] sm:$0xff]  ;;  %v290_v14 = vld [vmem:[%s2755_s19 + $0x68] sm:$0xff]  ;;  %v291_v15 = vld [vmem:[%s2755_s19 + $0x70] sm:$0xff]  ;;  %733 = vst [vmem:[#allocation2 + $0x59] sm:$0x1] %v2655_v36  ;;  %2472 = vmatprep.subr.bf16.mxu0 %v2471_v39  ;;  %s2656_s22 = smov [#allocation3]  }
  0x1e   : > { %v292_v16 = vld [vmem:[%s2755_s19 + $0x78] sm:$0xff]  ;;  %v293_v17 = vld [vmem:[%s2755_s19 + $0x80] sm:$0xff]  ;;  %v294_v18 = vld [vmem:[%s2755_s19 + $0x88] sm:$0xff]  ;;  %734 = vst [vmem:[#allocation2 + $0x71] sm:$0x1] %v2655_v36  ;;  %2510 = vmatpush3.bf16.msra.mxu1 %v2479_v45  ;;  %s2595_s23 = sshll.u32 %s2656_s22, 4  ;;  %s2596_s23 = int_to_ptr.vmem [resolvable:$false] %s2595_s23 }
  0x1f   : > { %2343 = vmatmul.mubr.msk.f32.gmra.mrb[2].mxu0 %vm317_vm1, %v280_v4  ;;  %v295_v19 = vld [vmem:[%s2755_s19 + $0x90] sm:$0xff]  ;;  %v296_v20 = vld [vmem:[%s2755_s19 + $0x98] sm:$0xff]  ;;  %v297_v21 = vld [vmem:[%s2755_s19 + $0xa0] sm:$0xff]  ;;  %735 = vst [vmem:[#allocation2 + $0x89] sm:$0x1] %v2655_v36  ;;  %2503 = vmatprep.subr.bf16.mxu1 %v2483_v48  ;;  %v2879_v4 = vrot.slane %v779_v62, %v916_v61  ;;  %s2597_s29 = scalar_lea.vmem %s2596_s23, 8192  ;;  %p2598_p0 = scmp.lt.s32.totalorder %s3859_s17, %s2596_s23 }
  0x20   : > { %2345 = vmatprep.mubr.msk.f32.mxu0 %vm317_vm1, %v281_v5  ;;  %v298_v22 = vld [vmem:[%s2755_s19 + $0xa8] sm:$0xff]  ;;  %v299_v23 = vld [vmem:[%s2755_s19 + $0xb0] sm:$0xff]  ;;  %v300_v24 = vld [vmem:[%s2755_s19 + $0xb8] sm:$0xff]  ;;  %736 = vst [vmem:[#allocation2 + $0xa1] sm:$0x1] %v2655_v36  ;;  %2474 = vmatpush3.bf16.msra.mxu0 %v2471_v39 }
  0x21   : > { %v301_v25 = vld [vmem:[%s2755_s19 + $0xc0] sm:$0xff]  ;;  %v302_v26 = vld [vmem:[%s2755_s19 + $0xc8] sm:$0xff]  ;;  %v303_v27 = vld [vmem:[%s2755_s19 + $0xd0] sm:$0xff]  ;;  %737 = vst [vmem:[#allocation2 + $0xb9] sm:$0x1] %v2655_v36  ;;  %2476 = vmatprep.subr.bf16.mxu0 %v2475_v42 }
  0x22   : > { %v304_v28 = vld [vmem:[%s2755_s19 + $0xd8] sm:$0xff]  ;;  %v305_v29 = vld [vmem:[%s2755_s19 + $0xe0] sm:$0xff]  ;;  %v306_v30 = vld [vmem:[%s2755_s19 + $0xe8] sm:$0xff]  ;;  %738 = vst [vmem:[#allocation2 + $0xd1] sm:$0x1] %v2655_v36  ;;  %2511 = vmatpush3.bf16.msra.mxu1 %v2483_v48 }
  0x23   : > { %2346 = vmatmul.mubr.msk.f32.gmra.mrb[4].mxu0 %vm317_vm1, %v282_v6  ;;  %v307_v31 = vld [vmem:[%s2755_s19 + $0xf0] sm:$0xff]  ;;  %v308_v32 = vld [vmem:[%s2755_s19 + $0xf8] sm:$0xff]  ;;  %739 = vst [vmem:[#allocation2 + $0xe9] sm:$0x1] %v2655_v36  ;;  %740 = vst [vmem:[#allocation2 + $0x101] sm:$0x1] %v2655_v36  ;;  %2504 = vmatprep.subr.bf16.mxu1 %v2487_v51 }
  0x24   : > { %2348 = vmatprep.mubr.msk.f32.mxu0 %vm317_vm1, %v283_v7  ;;  %741 = vst [vmem:[#allocation2 + $0x119] sm:$0x1] %v2655_v36  ;;  %742 = vst [vmem:[#allocation2 + $0x131] sm:$0x1] %v2655_v36  ;;  %2478 = vmatpush3.bf16.msra.mxu0 %v2475_v42  ;;  %v882_v2 = vld [vmem:[#allocation2 + $0x1] sm:$0xff]  ;;  %v883_v5 = vld [vmem:[#allocation2 + $0x9] sm:$0xff] }
  0x25   : > { %743 = vst [vmem:[#allocation2 + $0x149] sm:$0x1] %v2655_v36  ;;  %744 = vst [vmem:[#allocation2 + $0x161] sm:$0x1] %v2655_v36  ;;  %2480 = vmatprep.subr.bf16.mxu0 %v2479_v45 }
  0x26   : > { %745 = vst [vmem:[#allocation2 + $0x179] sm:$0x1] %v2655_v36  ;;  %746 = vst [vmem:[#allocation2 + $0x191] sm:$0x1] %v2655_v36  ;;  %2512 = vmatpush3.bf16.msra.mxu1 %v2487_v51 }
  0x27   : > { %2349 = vmatmul.mubr.msk.f32.gmra.mrb[6].mxu0 %vm317_vm1, %v284_v8  ;;  %2505 = vmatprep.subr.bf16.mxu1 %v2491_v54 }
  0x28   : > { %2351 = vmatprep.mubr.msk.f32.mxu0 %vm317_vm1, %v285_v9  ;;  %2482 = vmatpush3.bf16.msra.mxu0 %v2479_v45  ;;  %v818_v9 = vmul.f32 0.0, %v2877_v0 }
  0x29   : > { %2484 = vmatprep.subr.bf16.mxu0 %v2483_v48 }
  0x2a   : > { %2513 = vmatpush3.bf16.msra.mxu1 %v2491_v54 }
  0x2b   : > { %2352 = vmatmul.mubr.msk.f32.gmra.mrb[8].mxu0 %vm317_vm1, %v286_v10  ;;  %2506 = vmatprep.subr.bf16.mxu1 %v2495_v57  ;;  %v918_v10 = vmul.f32 %v2879_v4, %v882_v2 }
  0x2c   : > { %2354 = vmatprep.mubr.msk.f32.mxu0 %vm317_vm1, %v287_v11  ;;  %2486 = vmatpush3.bf16.msra.mxu0 %v2483_v48  ;;  %v2885_v11 = vrot.slane %v779_v62, %v1016_v1 }
  0x2d   : > { %2488 = vmatprep.subr.bf16.mxu0 %v2487_v51 }
  0x2e   : > { %2514 = vmatpush3.bf16.msra.mxu1 %v2495_v57 }
  0x2f   : > { %2355 = vmatmul.mubr.msk.f32.gmra.mrb[10].mxu0 %vm317_vm1, %v288_v12 }
  0x30   : > { %2357 = vmatprep.mubr.msk.f32.mxu0 %vm317_vm1, %v289_v13  ;;  %2490 = vmatpush3.bf16.msra.mxu0 %v2487_v51  ;;  %v982_v13 = vld [vmem:[#allocation2 + $0x2] sm:$0xff] }
  0x31   : > { %2492 = vmatprep.subr.bf16.mxu0 %v2491_v54 }
  0x33   : > { %2358 = vmatmul.mubr.msk.f32.gmra.mrb[12].mxu0 %vm317_vm1, %v290_v14  ;;  %v919_v14 = vmul.f32 %v2879_v4, %v883_v5 }
  0x34   : > { %2360 = vmatprep.mubr.msk.f32.mxu0 %vm317_vm1, %v291_v15  ;;  %2494 = vmatpush3.bf16.msra.mxu0 %v2491_v54 }
  0x35   : > { %2496 = vmatprep.subr.bf16.mxu0 %v2495_v57 }
  0x37   : > { %2361 = vmatmul.mubr.msk.f32.gmra.mrb[14].mxu0 %vm317_vm1, %v292_v16 }
  0x38   : > { %2363 = vmatprep.mubr.msk.f32.mxu0 %vm317_vm1, %v293_v17  ;;  %2498 = vmatpush3.bf16.msra.mxu0 %v2495_v57  ;;  %v983_v17 = vld [vmem:[#allocation2 + $0xa] sm:$0xff] }
  0x3b   : > { %2364 = vmatmul.mubr.msk.f32.gmra.mrb[16].mxu0 %vm317_vm1, %v294_v18 }
  0x3c   : > { %2366 = vmatprep.mubr.msk.f32.mxu0 %vm317_vm1, %v295_v19 }
  0x3f   : > { %2367 = vmatmul.mubr.msk.f32.gmra.mrb[18].mxu0 %vm317_vm1, %v296_v20 }
  0x40   : > { %2369 = vmatprep.mubr.msk.f32.mxu0 %vm317_vm1, %v297_v21  ;;  %v780_v21 = vld [vmem:[%s3909_s3 + $0x4] sm:$0x7] }
  0x41   : > { %v2903_v36 = vrot.slane %v780_v21, %v1016_v1  ;;  %v2908_v41 = vrot.slane %v780_v21, %v816_v60 }
  0x43   : > { %2370 = vmatmul.mubr.msk.f32.gmra.mrb[20].mxu0 %vm317_vm1, %v298_v22 }
  0x44   : > { %2372 = vmatprep.mubr.msk.f32.mxu0 %vm317_vm1, %v299_v23 }
  0x47   : > { %2373 = vmatmul.mubr.msk.f32.gmra.mrb[22].mxu0 %vm317_vm1, %v300_v24  ;;  %v781_v24 = vld [vmem:[%s3909_s3 + $0x8] sm:$0x7] }
  0x48   : > { %2375 = vmatprep.mubr.msk.f32.mxu0 %vm317_vm1, %v301_v25  ;;  %v950_v25 = vadd.f32 %v918_v10, %v818_v9  ;;  %v2905_v37 = vrot.slane %v781_v24, %v916_v61  ;;  %v2911_v43 = vrot.slane %v781_v24, %v816_v60  ;;  %v2913_v44 = vrot.slane %v781_v24, %v1016_v1 }
  0x4b   : > { %2376 = vmatmul.mubr.msk.f32.gmra.mrb[24].mxu0 %vm317_vm1, %v302_v26  ;;  %v1018_v26 = vmul.f32 %v2885_v11, %v982_v13 }
  0x4c   : > { %2378 = vmatprep.mubr.msk.f32.mxu0 %vm317_vm1, %v303_v27 }
  0x4d   : > { %v1050_v40 = vadd.f32 %v1018_v26, %v950_v25 }
  0x4f   : > { %2379 = vmatmul.mubr.msk.f32.gmra.mrb[26].mxu0 %vm317_vm1, %v304_v28  ;;  %v951_v28 = vadd.f32 %v919_v14, %v818_v9 }
  0x50   : > { %2381 = vmatprep.mubr.msk.f32.mxu0 %vm317_vm1, %v305_v29  ;;  %v1019_v29 = vmul.f32 %v2885_v11, %v983_v17 }
  0x52   : > { %v1051_v45 = vadd.f32 %v1019_v29, %v951_v28 }
  0x53   : > { %2382 = vmatmul.mubr.msk.f32.gmra.mrb[28].mxu0 %vm317_vm1, %v306_v30 }
  0x54   : > { %2384 = vmatprep.mubr.msk.f32.mxu0 %vm317_vm1, %v307_v31 }
  0x57   : > { %2385 = vmatmul.mubr.msk.f32.gmra.mrb[30].mxu0 %vm317_vm1, %v308_v32  ;;  %v2898_v32 = vrot.slane %v780_v21, %v916_v61 }
  0xee   : > { %v2341_v3 = vpop.f32.mrb[0].mxu0 }
  0xef   : > { %v490_v6 = vadd.f32 %v2341_v3, %v2875_v63  ;;  %v484_v7 = vpop.f32.mrb[1].mxu0 }
  0xf0   : > { %v485_v8 = vadd.f32 %v2875_v63, %v484_v7 }
  0xf1   : > { %v644_v12 = vmax.f32 %v490_v6, 0.0 }
  0xf2   : > { %v643_v15 = vmax.f32 %v485_v8, 0.0  ;;  %v2344_v16 = vpop.f32.mrb[2].mxu0 }
  0xf3   : > { %v676_v18 = vmin.f32 %v644_v12, 6.0  ;;  %v500_v19 = vadd.f32 %v2344_v16, %v2875_v63  ;;  %v494_v20 = vpop.f32.mrb[3].mxu0 }
  0xf4   : > { %v675_v22 = vmin.f32 %v643_v15, 6.0  ;;  %v495_v23 = vadd.f32 %v2875_v63, %v494_v20 }
  0xf5   : > { %748 = vst [vmem:[#allocation2 + $0x21] sm:$0xff] %v676_v18  ;;  %v646_v27 = vmax.f32 %v500_v19, 0.0  ;;  %v1219_v49 = vmul.f32 %v2898_v32, %v676_v18  ;;  %v2918_v50 = vmul.f32 %v2879_v4, %v676_v18 }
  0xf6   : > { %747 = vst [vmem:[#allocation2 + $0x19] sm:$0xff] %v675_v22  ;;  %v645_v30 = vmax.f32 %v495_v23, 0.0  ;;  %v2347_v31 = vpop.f32.mrb[4].mxu0  ;;  %v1218_v48 = vmul.f32 %v2898_v32, %v675_v22  ;;  %v920_v55 = vmul.f32 %v2879_v4, %v675_v22 }
  0xf7   : > { %v2900_v33 = vmin.f32 %v646_v27, 6.0  ;;  %v510_v34 = vadd.f32 %v2347_v31, %v2875_v63  ;;  %v504_v35 = vpop.f32.mrb[5].mxu0 }
  0xf8   : > { %v677_v38 = vmin.f32 %v645_v30, 6.0  ;;  %v505_v39 = vadd.f32 %v2875_v63, %v504_v35 }
  0xf9   : > { %750 = vst [vmem:[#allocation2 + $0x39] sm:$0xff] %v2900_v33  ;;  %v648_v42 = vmax.f32 %v510_v34, 0.0  ;;  %v2925_v54 = vmul.f32 %v2905_v37, %v2900_v33  ;;  %v2936_v60 = vmul.f32 %v2898_v32, %v2900_v33 }
  0xfa   : > { %749 = vst [vmem:[#allocation2 + $0x31] sm:$0xff] %v677_v38  ;;  %v647_v46 = vmax.f32 %v505_v39, 0.0  ;;  %v2350_v47 = vpop.f32.mrb[6].mxu0  ;;  %v2932_v58 = vmul.f32 %v2905_v37, %v677_v38  ;;  %v2943_v5 = vmul.f32 %v2898_v32, %v677_v38  ;;  %v2946_v6 = vmul.f32 %v2879_v4, %v677_v38 }
  0xfb   : > { %v2920_v51 = vmin.f32 %v648_v42, 6.0  ;;  %v520_v52 = vadd.f32 %v2350_v47, %v2875_v63  ;;  %v514_v53 = vpop.f32.mrb[7].mxu0 }
  0xfc   : > { %v2928_v56 = vmin.f32 %v647_v46, 6.0  ;;  %v515_v57 = vadd.f32 %v2875_v63, %v514_v53  ;;  %v1283_v59 = vld [vmem:[#allocation2 + $0x22] sm:$0xff] }
  0xfd   : > { %752 = vst [vmem:[#allocation2 + $0x51] sm:$0xff] %v2920_v51  ;;  %v650_v61 = vmax.f32 %v520_v52, 0.0  ;;  %v1082_v62 = vld [vmem:[#allocation2 + $0x18] sm:$0xff]  ;;  %v2939_v2 = vld [vmem:[#allocation2 + $0x20] sm:$0xff]  ;;  %v1319_v3 = vmul.f32 %v2903_v36, %v1283_v59  ;;  %v2953_v12 = vmul.f32 %v1283_v59, %v2885_v11 }
  0xfe   : > { %v1282_v1 = vld [vmem:[#allocation2 + $0x1a] sm:$0xff]  ;;  %751 = vst [vmem:[#allocation2 + $0x49] sm:$0xff] %v2928_v56  ;;  %v649_v7 = vmax.f32 %v515_v57, 0.0  ;;  %v2353_v8 = vpop.f32.mrb[8].mxu0  ;;  %v1118_v9 = vmul.f32 %v2908_v41, %v1082_v62  ;;  %v1119_v10 = vmul.f32 %v2908_v41, %v2939_v2  ;;  %v820_v17 = vmul.f32 %v1082_v62, %v2877_v0 }
  0xff   : > { %v2955_v13 = vmin.f32 %v650_v61, 6.0  ;;  %v530_v14 = vadd.f32 %v2353_v8, %v2875_v63  ;;  %v524_v15 = vpop.f32.mrb[9].mxu0  ;;  %v1318_v16 = vmul.f32 %v2903_v36, %v1282_v1  ;;  %v1020_v28 = vmul.f32 %v1282_v1, %v2885_v11 }
 0x100   : > { %v2960_v18 = vmin.f32 %v649_v7, 6.0  ;;  %v525_v19 = vadd.f32 %v2875_v63, %v524_v15  ;;  %v1150_v20 = vadd.f32 %v1118_v9, %v1050_v40  ;;  %v1151_v21 = vadd.f32 %v1119_v10, %v1051_v45  ;;  %v2963_v22 = vld [vmem:[#allocation2 + $0x3a] sm:$0xff] }
 0x101   : > { %754 = vst [vmem:[#allocation2 + $0x69] sm:$0xff] %v2955_v13  ;;  %v652_v23 = vmax.f32 %v530_v14, 0.0  ;;  %v2966_v24 = vld [vmem:[#allocation2 + $0x30] sm:$0xff]  ;;  %v1620_v26 = vmul.f32 %v2913_v44, %v2963_v22  ;;  %v952_v27 = vadd.f32 %v920_v55, %v820_v17  ;;  %v2976_v35 = vld [vmem:[#allocation2 + $0x38] sm:$0xff]  ;;  %v2980_v38 = vmul.f32 %v2905_v37, %v2928_v56 }
 0x102   : > { %v2968_v25 = vld [vmem:[#allocation2 + $0x32] sm:$0xff]  ;;  %753 = vst [vmem:[#allocation2 + $0x61] sm:$0xff] %v2960_v18  ;;  %v651_v29 = vmax.f32 %v525_v19, 0.0  ;;  %v2356_v30 = vpop.f32.mrb[10].mxu0  ;;  %v1250_v31 = vadd.f32 %v1218_v48, %v1150_v20  ;;  %v1419_v34 = vmul.f32 %v2911_v43, %v2966_v24  ;;  %v1251_v46 = vadd.f32 %v1219_v49, %v1151_v21 }
 0x103   : > { %v2982_v39 = vmin.f32 %v652_v23, 6.0  ;;  %v540_v40 = vadd.f32 %v2356_v30, %v2875_v63  ;;  %v534_v42 = vpop.f32.mrb[11].mxu0  ;;  %v1619_v45 = vmul.f32 %v2913_v44, %v2968_v25  ;;  %v1052_v53 = vadd.f32 %v1020_v28, %v952_v27  ;;  %v3017_v28 = vld [vmem:[%s3910_s4] ss:$0 sm:$0xff] }
 0x104   : > { %v2987_v47 = vmin.f32 %v651_v29, 6.0  ;;  %v535_v48 = vadd.f32 %v2875_v63, %v534_v42  ;;  %v1350_v52 = vadd.f32 %v1318_v16, %v1250_v31  ;;  %v1351_v57 = vadd.f32 %v1319_v3, %v1251_v46 }
 0x105   : > { %756 = vst [vmem:[#allocation2 + $0x81] sm:$0xff] %v2982_v39  ;;  %v654_v55 = vmax.f32 %v540_v40, 0.0  ;;  %v1420_v59 = vmul.f32 %v2911_v43, %v2976_v35  ;;  %v1120_v61 = vmul.f32 %v2966_v24, %v2908_v41  ;;  %v2995_v62 = vld [vmem:[#allocation2 + $0x48] sm:$0xff]  ;;  %v1320_v8 = vmul.f32 %v2968_v25, %v2903_v36 }
 0x106   : > { %755 = vst [vmem:[#allocation2 + $0x79] sm:$0xff] %v2987_v47  ;;  %v653_v49 = vmax.f32 %v535_v48, 0.0  ;;  %v2359_v1 = vpop.f32.mrb[12].mxu0  ;;  %v1451_v7 = vadd.f32 %v1419_v34, %v1350_v52  ;;  %v1421_v9 = vmul.f32 %v2911_v43, %v2995_v62  ;;  %v3002_v3 = vld [vmem:[#allocation2 + $0x4a] sm:$0xff]  ;;  %v821_v23 = vmul.f32 %v2939_v2, %v2877_v0 }
 0x107   : > { %v3004_v10 = vmin.f32 %v654_v55, 6.0  ;;  %v550_v14 = vadd.f32 %v2359_v1, %v2875_v63  ;;  %v544_v15 = vpop.f32.mrb[13].mxu0  ;;  %v1452_v16 = vadd.f32 %v1420_v59, %v1351_v57  ;;  %v1152_v17 = vadd.f32 %v1120_v61, %v1052_v53 }
 0x108   : > { %v3007_v19 = vmin.f32 %v653_v49, 6.0  ;;  %v545_v20 = vadd.f32 %v2875_v63, %v544_v15  ;;  %v1551_v21 = vadd.f32 %v2932_v58, %v1451_v7  ;;  %v1621_v31 = vmul.f32 %v2913_v44, %v3002_v3 }
 0x109   : > { %758 = vst [vmem:[#allocation2 + $0x99] sm:$0xff] %v3004_v10  ;;  %v656_v27 = vmax.f32 %v550_v14, 0.0  ;;  %v1552_v29 = vadd.f32 %v2925_v54, %v1452_v16  ;;  %v1252_v30 = vadd.f32 %v2943_v5, %v1152_v17  ;;  %v953_v40 = vadd.f32 %v2918_v50, %v821_v23  ;;  %v3028_v5 = vld [vmem:[#allocation2 + $0x50] sm:$0xff] }
 0x10a   : > { %757 = vst [vmem:[#allocation2 + $0x91] sm:$0xff] %v3007_v19  ;;  %v655_v58 = vmax.f32 %v545_v20, 0.0  ;;  %v2362_v34 = vpop.f32.mrb[14].mxu0  ;;  %v1651_v2 = vadd.f32 %v1619_v45, %v1551_v21  ;;  %v1121_v42 = vmul.f32 %v2976_v35, %v2908_v41  ;;  %v1321_v1 = vmul.f32 %v2963_v22, %v2903_v36 }
 0x10b   : > { %v688_v46 = vmin.f32 %v656_v27, 6.0  ;;  %v560_v48 = vadd.f32 %v2362_v34, %v2875_v63  ;;  %v554_v52 = vpop.f32.mrb[15].mxu0  ;;  %v1652_v54 = vadd.f32 %v1620_v26, %v1552_v29  ;;  %v1352_v53 = vadd.f32 %v1320_v8, %v1252_v30 }
 0x10c   : > { %v3030_v55 = vmin.f32 %v655_v58, 6.0  ;;  %v555_v57 = vadd.f32 %v2875_v63, %v554_v52  ;;  %v1690_v59 = vadd.f32 %v3017_v28, %v1651_v2  ;;  %v1053_v45 = vadd.f32 %v2953_v12, %v953_v40 }
 0x10d   : > { %760 = vst [vmem:[#allocation2 + $0xb1] sm:$0xff] %v688_v46  ;;  %v658_v50 = vmax.f32 %v560_v48, 0.0  ;;  %v1691_v61 = vadd.f32 %v3017_v28, %v1652_v54  ;;  %v1453_v49 = vadd.f32 %v1421_v9, %v1352_v53  ;;  %v1422_v15 = vmul.f32 %v2911_v43, %v3028_v5  ;;  %v3053_v53 = vld [vmem:[#allocation2 + $0x52] sm:$0xff] }
 0x10e   : > { %759 = vst [vmem:[#allocation2 + $0xa9] sm:$0xff] %v3030_v55  ;;  %v657_v26 = vmax.f32 %v555_v57, 0.0  ;;  %v2365_v7 = vpop.f32.mrb[16].mxu0  ;;  %v1722_v8 = vmax.f32 %v1690_v59, 0.0  ;;  %v1153_v14 = vadd.f32 %v1121_v42, %v1053_v45  ;;  %v822_v2 = vmul.f32 %v2966_v24, %v2877_v0 }
 0x10f   : > { %v690_v16 = vmin.f32 %v658_v50, 6.0  ;;  %v570_v12 = vadd.f32 %v2365_v7, %v2875_v63  ;;  %v564_v17 = vpop.f32.mrb[17].mxu0  ;;  %v1723_v20 = vmax.f32 %v1691_v61, 0.0  ;;  %v1553_v21 = vadd.f32 %v2980_v38, %v1453_v49 }
 0x110   : > { %v689_v9 = vmin.f32 %v657_v26, 6.0  ;;  %v565_v23 = vadd.f32 %v2875_v63, %v564_v17  ;;  %v1754_v27 = vmin.f32 %v1722_v8, 6.0  ;;  %v1253_v29 = vadd.f32 %v2936_v60, %v1153_v14 }
 0x111   : > { %762 = vst [vmem:[#allocation2 + $0xc9] sm:$0xff] %v690_v16  ;;  %v660_v30 = vmax.f32 %v570_v12, 0.0  ;;  %v1755_v58 = vmin.f32 %v1723_v20, 6.0  ;;  %v1653_v34 = vadd.f32 %v1621_v31, %v1553_v21  ;;  %v1022_v38 = vmul.f32 %v2968_v25, %v2885_v11 }
 0x112   : > { %761 = vst [vmem:[#allocation2 + $0xc1] sm:$0xff] %v689_v9  ;;  %v659_v40 = vmax.f32 %v565_v23, 0.0  ;;  %v2368_v42 = vpop.f32.mrb[18].mxu0  ;;  %2419 = vmatprep.mubr.f32.mxu0 %v1754_v27  ;;  %v1353_v46 = vadd.f32 %v1321_v1, %v1253_v29  ;;  %v1122_v48 = vmul.f32 %v2995_v62, %v2908_v41  ;;  %v954_v24 = vadd.f32 %v2946_v6, %v822_v2 }
 0x113   : > { %v692_v52 = vmin.f32 %v660_v30, 6.0  ;;  %v580_v60 = vadd.f32 %v2368_v42, %v2875_v63  ;;  %v574_v54 = vpop.f32.mrb[19].mxu0  ;;  %2420 = vmatmul.mubr.f32.vlgmr.msra.gmra.mrb[32].mxu0 %v1755_v58  ;;  %v1692_v31 = vadd.f32 %v3017_v28, %v1653_v34  ;;  %v1522_v25 = vmul.f32 %v2905_v37, %v2920_v51 }
 0x114   : > { %v691_v57 = vmin.f32 %v659_v40, 6.0  ;;  %v575_v59 = vadd.f32 %v2875_v63, %v574_v54  ;;  %v1454_v45 = vadd.f32 %v1422_v15, %v1353_v46  ;;  %v1054_v49 = vadd.f32 %v1022_v38, %v954_v24  ;;  %v3065_v15 = vld [vmem:[#allocation2 + $0x60] sm:$0xff] }
 0x115   : > { %764 = vst [vmem:[#allocation2 + $0xe1] sm:$0xff] %v692_v52  ;;  %v662_v50 = vmax.f32 %v580_v60, 0.0  ;;  %v1724_v61 = vmax.f32 %v1692_v31, 0.0  ;;  %v923_v1 = vmul.f32 %v2879_v4, %v2900_v33  ;;  %v1622_v6 = vmul.f32 %v2913_v44, %v3053_v53  ;;  %v3081_v54 = vld [vmem:[#allocation2 + $0x62] sm:$0xff] }
 0x116   : > { %763 = vst [vmem:[#allocation2 + $0xd9] sm:$0xff] %v691_v57  ;;  %v661_v26 = vmax.f32 %v575_v59, 0.0  ;;  %v2371_v7 = vpop.f32.mrb[20].mxu0  ;;  %v1554_v8 = vadd.f32 %v1522_v25, %v1454_v45  ;;  %v1222_v14 = vmul.f32 %v2898_v32, %v2928_v56  ;;  %v1154_v21 = vadd.f32 %v1122_v48, %v1054_v49 }
 0x117   : > { %v694_v16 = vmin.f32 %v662_v50, 6.0  ;;  %v590_v12 = vadd.f32 %v2371_v7, %v2875_v63  ;;  %v1756_v17 = vmin.f32 %v1724_v61, 6.0  ;;  %v584_v20 = vpop.f32.mrb[21].mxu0  ;;  %v1322_v27 = vmul.f32 %v3002_v3, %v2903_v36 }
 0x118   : > { %v693_v9 = vmin.f32 %v661_v26, 6.0  ;;  %v585_v33 = vadd.f32 %v2875_v63, %v584_v20  ;;  %v1654_v23 = vadd.f32 %v1622_v6, %v1554_v8  ;;  %v1254_v30 = vadd.f32 %v1222_v14, %v1154_v21 }
 0x119   : > { %766 = vst [vmem:[#allocation2 + $0xf9] sm:$0xff] %v694_v16  ;;  %v664_v29 = vmax.f32 %v590_v12, 0.0  ;;  %2422 = vmatprep.mubr.f32.mxu0 %v1756_v17  ;;  %v1423_v58 = vmul.f32 %v2911_v43, %v3065_v15  ;;  %v823_v34 = vmul.f32 %v2976_v35, %v2877_v0  ;;  %v1023_v46 = vmul.f32 %v2963_v22, %v2885_v11  ;;  %v3090_v16 = vld [vmem:[#allocation2 + $0x68] sm:$0xff] }
 0x11a   : > { %765 = vst [vmem:[#allocation2 + $0xf1] sm:$0xff] %v693_v9  ;;  %v663_v2 = vmax.f32 %v585_v33, 0.0  ;;  %v1693_v40 = vadd.f32 %v3017_v28, %v1654_v23  ;;  %v2374_v42 = vpop.f32.mrb[22].mxu0  ;;  %v1123_v38 = vmul.f32 %v3028_v5, %v2908_v41  ;;  %v1354_v60 = vadd.f32 %v1322_v27, %v1254_v30 }
 0x11b   : > { %v696_v48 = vmin.f32 %v664_v29, 6.0  ;;  %v600_v52 = vadd.f32 %v2374_v42, %v2875_v63  ;;  %v594_v31 = vpop.f32.mrb[23].mxu0  ;;  %v955_v24 = vadd.f32 %v923_v1, %v823_v34  ;;  %v1523_v22 = vmul.f32 %v2905_v37, %v2960_v18  ;;  %v3099_v29 = vld [vmem:[#allocation2 + $0x6a] sm:$0xff] }
 0x11c   : > { %v695_v35 = vmin.f32 %v663_v2, 6.0  ;;  %v1725_v57 = vmax.f32 %v1693_v40, 0.0  ;;  %v595_v59 = vadd.f32 %v2875_v63, %v594_v31  ;;  %v1455_v25 = vadd.f32 %v1423_v58, %v1354_v60 }
 0x11d   : > { %768 = vst [vmem:[#allocation2 + $0x111] sm:$0xff] %v696_v48  ;;  %v666_v45 = vmax.f32 %v600_v52, 0.0  ;;  %v1055_v50 = vadd.f32 %v1023_v46, %v955_v24  ;;  %v1623_v49 = vmul.f32 %v2913_v44, %v3081_v54  ;;  %v1223_v1 = vmul.f32 %v2898_v32, %v2920_v51 }
 0x11e   : > { %767 = vst [vmem:[#allocation2 + $0x109] sm:$0xff] %v695_v35  ;;  %v1757_v61 = vmin.f32 %v1725_v57, 6.0  ;;  %v665_v26 = vmax.f32 %v595_v59, 0.0  ;;  %v2377_v7 = vpop.f32.mrb[24].mxu0  ;;  %v1555_v6 = vadd.f32 %v1523_v22, %v1455_v25  ;;  %v824_v21 = vmul.f32 %v2995_v62, %v2877_v0  ;;  %v3117_v59 = vld [vmem:[#allocation2 + $0x78] sm:$0xff] }
 0x11f   : > { %v698_v8 = vmin.f32 %v666_v45, 6.0  ;;  %v1155_v14 = vadd.f32 %v1123_v38, %v1055_v50  ;;  %v610_v12 = vadd.f32 %v2377_v7, %v2875_v63  ;;  %v604_v17 = vpop.f32.mrb[25].mxu0  ;;  %v924_v9 = vmul.f32 %v2879_v4, %v2928_v56  ;;  %v3123_v50 = vld [vmem:[#allocation2 + $0x7a] sm:$0xff] }
 0x120   : > { %2423 = vmatmul.mubr.f32.gmra.mrb[34].mxu0 %v1757_v61  ;;  %v697_v20 = vmin.f32 %v665_v26, 6.0  ;;  %v1655_v33 = vadd.f32 %v1623_v49, %v1555_v6  ;;  %v1323_v27 = vmul.f32 %v3053_v53, %v2903_v36  ;;  %v1424_v58 = vmul.f32 %v2911_v43, %v3090_v16 }
 0x121   : > { %770 = vst [vmem:[#allocation2 + $0x129] sm:$0xff] %v698_v8  ;;  %v1255_v23 = vadd.f32 %v1223_v1, %v1155_v14  ;;  %v668_v30 = vmax.f32 %v610_v12, 0.0  ;;  %v956_v34 = vadd.f32 %v924_v9, %v824_v21  ;;  %v1024_v62 = vmul.f32 %v3002_v3, %v2885_v11 }
 0x122   : > { %769 = vst [vmem:[#allocation2 + $0x121] sm:$0xff] %v697_v20  ;;  %v1124_v56 = vmul.f32 %v3065_v15, %v2908_v41  ;;  %v2380_v2 = vpop.f32.mrb[26].mxu0  ;;  %v1694_v40 = vadd.f32 %v3017_v28, %v1655_v33  ;;  %v1524_v46 = vmul.f32 %v2905_v37, %v2955_v13  ;;  %v1624_v52 = vmul.f32 %v2913_v44, %v3099_v29 }
 0x123   : > { %v1355_v42 = vadd.f32 %v1323_v27, %v1255_v23  ;;  %v700_v38 = vmin.f32 %v668_v30, 6.0  ;;  %v614_v48 = vpop.f32.mrb[27].mxu0  ;;  %v1056_v60 = vadd.f32 %v1024_v62, %v956_v34  ;;  %v605_v31 = vadd.f32 %v2875_v63, %v604_v17  ;;  %v3145_v27 = vld [vmem:[#allocation2 + $0x80] sm:$0xff] }
 0x124   : > { %v825_v3 = vmul.f32 %v3028_v5, %v2877_v0  ;;  %v1726_v24 = vmax.f32 %v1694_v40, 0.0  ;;  %v1224_v57 = vmul.f32 %v2898_v32, %v2960_v18  ;;  %v925_v45 = vmul.f32 %v2879_v4, %v2920_v51  ;;  %v3156_v40 = vld [vmem:[#allocation2 + $0x82] sm:$0xff] }
 0x125   : > { %v1456_v35 = vadd.f32 %v1424_v58, %v1355_v42  ;;  %772 = vst [vmem:[#allocation2 + $0x141] sm:$0xff] %v700_v38  ;;  %v1156_v25 = vadd.f32 %v1124_v56, %v1056_v60  ;;  %v1324_v22 = vmul.f32 %v3081_v54, %v2903_v36  ;;  %v667_v61 = vmax.f32 %v605_v31, 0.0 }
 0x126   : > { %v1025_v5 = vmul.f32 %v3053_v53, %v2885_v11  ;;  %v3127_v49 = vpop.f32.mrb[28].mxu0  ;;  %v1758_v26 = vmin.f32 %v1726_v24, 6.0  ;;  %v957_v7 = vadd.f32 %v925_v45, %v825_v3  ;;  %v1125_v8 = vmul.f32 %v3090_v16, %v2908_v41 }
 0x127   : > { %v1556_v1 = vadd.f32 %v1524_v46, %v1456_v35  ;;  %v3131_v6 = vpop.f32.mrb[29].mxu0  ;;  %v1256_v51 = vadd.f32 %v1224_v57, %v1156_v25  ;;  %v1425_v14 = vmul.f32 %v2911_v43, %v3117_v59  ;;  %v1525_v12 = vmul.f32 %v2905_v37, %v2987_v47 }
 0x128   : > { %v3137_v17 = vmin.f32 %v667_v61, 6.0  ;;  %2425 = vmatprep.mubr.f32.mxu0 %v1758_v26  ;;  %v1625_v20 = vmul.f32 %v2913_v44, %v3123_v50  ;;  %v1057_v21 = vadd.f32 %v1025_v5, %v957_v7  ;;  %v620_v9 = vadd.f32 %v2380_v2, %v2875_v63 }
 0x129   : > { %v1656_v53 = vadd.f32 %v1624_v52, %v1556_v1  ;;  %v1356_v33 = vadd.f32 %v1324_v22, %v1256_v51  ;;  %v1225_v23 = vmul.f32 %v2898_v32, %v2955_v13  ;;  %v826_v30 = vmul.f32 %v3065_v15, %v2877_v0 }
 0x12a   : > { %771 = vst [vmem:[#allocation2 + $0x139] sm:$0xff] %v3137_v17  ;;  %v926_v58 = vmul.f32 %v2879_v4, %v2960_v18  ;;  %v3151_v34 = vpop.f32.mrb[30].mxu0  ;;  %v1157_v56 = vadd.f32 %v1125_v8, %v1057_v21  ;;  %v1325_v2 = vmul.f32 %v3099_v29, %v2903_v36  ;;  %v670_v42 = vmax.f32 %v620_v9, 0.0  ;;  %v3175_v8 = vld [vmem:[#allocation2 + $0x90] sm:$0xff] }
 0x12b   : > { %v1695_v62 = vadd.f32 %v3017_v28, %v1656_v53  ;;  %v3158_v46 = vpop.f32.mrb[31].mxu0  ;;  %v1457_v38 = vadd.f32 %v1425_v14, %v1356_v33  ;;  %v1026_v15 = vmul.f32 %v3081_v54, %v2885_v11  ;;  %v1126_v18 = vmul.f32 %v3117_v59, %v2908_v41 }
 0x12c   : > { %v958_v52 = vadd.f32 %v926_v58, %v826_v30  ;;  %v1257_v31 = vadd.f32 %v1225_v23, %v1157_v56  ;;  %v1426_v3 = vmul.f32 %v2911_v43, %v3145_v27  ;;  %v702_v24 = vmin.f32 %v670_v42, 6.0  ;;  %v3194_v42 = vld [vmem:[#allocation2 + $0x92] sm:$0xff] }
 0x12d   : > { %v1727_v60 = vmax.f32 %v1695_v62, 0.0  ;;  %v1557_v35 = vadd.f32 %v1525_v12, %v1457_v38  ;;  %v1526_v57 = vmul.f32 %v2905_v37, %v2982_v39  ;;  %v1626_v45 = vmul.f32 %v2913_v44, %v3156_v40 }
 0x12e   : > { %v1058_v25 = vadd.f32 %v1026_v15, %v958_v52  ;;  %v1357_v61 = vadd.f32 %v1325_v2, %v1257_v31  ;;  %774 = vst [vmem:[#allocation2 + $0x159] sm:$0xff] %v702_v24  ;;  %v615_v54 = vadd.f32 %v2875_v63, %v614_v48  ;;  %v827_v5 = vmul.f32 %v3090_v16, %v2877_v0 }
 0x12f   : > { %v1759_v22 = vmin.f32 %v1727_v60, 6.0  ;;  %v1657_v26 = vadd.f32 %v1625_v20, %v1557_v35  ;;  %v1226_v7 = vmul.f32 %v2898_v32, %v2987_v47  ;;  %v927_v51 = vmul.f32 %v2879_v4, %v2955_v13 }
 0x130   : > { %v1158_v1 = vadd.f32 %v1126_v18, %v1058_v25  ;;  %v1458_v14 = vadd.f32 %v1426_v3, %v1357_v61  ;;  %v1326_v12 = vmul.f32 %v3123_v50, %v2903_v36  ;;  %v669_v53 = vmax.f32 %v615_v54, 0.0  ;;  %v3203_v3 = vld [vmem:[#allocation2 + $0x98] sm:$0xff] }
 0x131   : > { %2426 = vmatmul.mubr.f32.gmra.mrb[36].mxu0 %v1759_v22  ;;  %v1027_v48 = vmul.f32 %v3099_v29, %v2885_v11  ;;  %v1696_v16 = vadd.f32 %v3017_v28, %v1657_v26  ;;  %v959_v21 = vadd.f32 %v927_v51, %v827_v5  ;;  %v1127_v9 = vmul.f32 %v3145_v27, %v2908_v41  ;;  %v3216_v61 = vld [vmem:[#allocation2 + $0x9a] sm:$0xff] }
 0x132   : > { %v1258_v20 = vadd.f32 %v1226_v7, %v1158_v1  ;;  %v1558_v33 = vadd.f32 %v1526_v57, %v1458_v14  ;;  %v1427_v13 = vmul.f32 %v2911_v43, %v3175_v8  ;;  %v1527_v23 = vmul.f32 %v2905_v37, %v3007_v19  ;;  %v893_v26 = vld [vmem:[#allocation2 + $0x81] sm:$0xff] }
 0x133   : > { %v3190_v30 = vmin.f32 %v669_v53, 6.0  ;;  %v1728_v58 = vmax.f32 %v1696_v16, 0.0  ;;  %v1059_v56 = vadd.f32 %v1027_v48, %v959_v21  ;;  %v1227_v29 = vmul.f32 %v2898_v32, %v2982_v39 }
 0x134   : > { %v1358_v62 = vadd.f32 %v1326_v12, %v1258_v20  ;;  %v1658_v2 = vadd.f32 %v1626_v45, %v1558_v33  ;;  %v630_v38 = vadd.f32 %v3127_v49, %v2875_v63  ;;  %v828_v52 = vmul.f32 %v3117_v59, %v2877_v0  ;;  %v3229_v33 = vld [vmem:[#allocation2 + $0xa8] sm:$0xff] }
 0x135   : > { %773 = vst [vmem:[#allocation2 + $0x151] sm:$0xff] %v3190_v30  ;;  %v928_v15 = vmul.f32 %v2879_v4, %v2987_v47  ;;  %v1760_v18 = vmin.f32 %v1728_v58, 6.0  ;;  %v1159_v31 = vadd.f32 %v1127_v9, %v1059_v56  ;;  %v1028_v39 = vmul.f32 %v3123_v50, %v2885_v11 }
 0x136   : > { %v1459_v60 = vadd.f32 %v1427_v13, %v1358_v62  ;;  %v1697_v24 = vadd.f32 %v3017_v28, %v1658_v2  ;;  %v672_v35 = vmax.f32 %v630_v38, 0.0  ;;  %v1128_v49 = vmul.f32 %v3175_v8, %v2908_v41  ;;  %v894_v2 = vld [vmem:[#allocation2 + $0x91] sm:$0xff] }
 0x137   : > { %v960_v57 = vadd.f32 %v928_v15, %v828_v52  ;;  %2428 = vmatprep.mubr.f32.mxu1 %v1760_v18  ;;  %v1627_v47 = vmul.f32 %v2913_v44, %v3194_v42  ;;  %v1259_v45 = vadd.f32 %v1227_v29, %v1159_v31  ;;  %v1327_v25 = vmul.f32 %v3156_v40, %v2903_v36 }
 0x138   : > { %v1559_v59 = vadd.f32 %v1527_v23, %v1459_v60  ;;  %v1729_v22 = vmax.f32 %v1697_v24, 0.0  ;;  %v1428_v50 = vmul.f32 %v2911_v43, %v3203_v3  ;;  %v704_v54 = vmin.f32 %v672_v35, 6.0  ;;  %v3234_v23 = vld [vmem:[#allocation2 + $0xaa] sm:$0xff]  ;;  %v1193_v60 = vld [vmem:[#allocation2 + $0x99] sm:$0xff] }
 0x139   : > { %v1060_v5 = vadd.f32 %v1028_v39, %v960_v57  ;;  %v1359_v7 = vadd.f32 %v1327_v25, %v1259_v45  ;;  %v1528_v51 = vmul.f32 %v2905_v37, %v3004_v10  ;;  %v1228_v14 = vmul.f32 %v2898_v32, %v3007_v19  ;;  %v3249_v57 = vld [vmem:[#allocation2 + $0xb0] sm:$0xff] }
 0x13a   : > { %v1659_v1 = vadd.f32 %v1627_v47, %v1559_v59  ;;  %v1761_v12 = vmin.f32 %v1729_v22, 6.0  ;;  %776 = vst [vmem:[#allocation2 + $0x171] sm:$0xff] %v704_v54  ;;  %v625_v48 = vadd.f32 %v2875_v63, %v3131_v6  ;;  %v829_v16 = vmul.f32 %v3145_v27, %v2877_v0  ;;  %v3258_v22 = vld [vmem:[#allocation2 + $0xb1] sm:$0xff] }
 0x13b   : > { %v1160_v53 = vadd.f32 %v1128_v49, %v1060_v5  ;;  %v1460_v21 = vadd.f32 %v1428_v50, %v1359_v7  ;;  %v1628_v9 = vmul.f32 %v2913_v44, %v3216_v61  ;;  %v929_v10 = vmul.f32 %v2879_v4, %v893_v26 }
 0x13c   : > { %v1698_v20 = vadd.f32 %v3017_v28, %v1659_v1  ;;  %2429 = vmatmul.mubr.f32.vlgmr.msra.gmra.mrb[0].mxu1 %v1761_v12  ;;  %v1328_v13 = vmul.f32 %v3194_v42, %v2903_v36  ;;  %v671_v6 = vmax.f32 %v625_v48, 0.0  ;;  %v1029_v27 = vmul.f32 %v3156_v40, %v2885_v11 }
 0x13d   : > { %v1260_v19 = vadd.f32 %v1228_v14, %v1160_v53  ;;  %v1560_v62 = vadd.f32 %v1528_v51, %v1460_v21  ;;  %v961_v56 = vadd.f32 %v929_v10, %v829_v16  ;;  %v1129_v29 = vmul.f32 %v3203_v3, %v2908_v41 }
 0x13e   : > { %v1730_v58 = vmax.f32 %v1698_v20, 0.0  ;;  %v1429_v52 = vmul.f32 %v2911_v43, %v3229_v33  ;;  %v1529_v15 = vmul.f32 %v2905_v37, %v3030_v55  ;;  %v3244_v18 = vmin.f32 %v671_v6, 6.0  ;;  %v3274_v6 = vld [vmem:[#allocation2 + $0xc0] sm:$0xff] }
 0x13f   : > { %v1360_v38 = vadd.f32 %v1328_v13, %v1260_v19  ;;  %v1660_v39 = vadd.f32 %v1628_v9, %v1560_v62  ;;  %v1629_v40 = vmul.f32 %v2913_v44, %v3234_v23  ;;  %v1061_v24 = vadd.f32 %v1029_v27, %v961_v56  ;;  %v1594_v19 = vld [vmem:[#allocation2 + $0xb2] sm:$0xff] }
 0x140   : > { %v1762_v31 = vmin.f32 %v1730_v58, 6.0  ;;  %775 = vst [vmem:[#allocation2 + $0x169] sm:$0xff] %v3244_v18  ;;  %v640_v49 = vadd.f32 %v3151_v34, %v2875_v63  ;;  %v830_v55 = vmul.f32 %v3175_v8, %v2877_v0  ;;  %v930_v59 = vmul.f32 %v2879_v4, %v894_v2  ;;  %v1194_v8 = vld [vmem:[#allocation2 + $0xa9] sm:$0xff] }
 0x141   : > { %v1461_v35 = vadd.f32 %v1429_v52, %v1360_v38  ;;  %v1699_v47 = vadd.f32 %v3017_v28, %v1660_v39  ;;  %v1161_v45 = vadd.f32 %v1129_v29, %v1061_v24  ;;  %v1229_v25 = vmul.f32 %v2898_v32, %v1193_v60  ;;  %v3281_v29 = vld [vmem:[#allocation2 + $0xc1] sm:$0xff] }
 0x142   : > { %2431 = vmatprep.mubr.f32.mxu1 %v1762_v31  ;;  %v1030_v50 = vmul.f32 %v3194_v42, %v2885_v11  ;;  %v674_v5 = vmax.f32 %v640_v49, 0.0  ;;  %v962_v26 = vadd.f32 %v930_v59, %v830_v55  ;;  %v1130_v34 = vmul.f32 %v3229_v33, %v2908_v41  ;;  %v3285_v52 = vld [vmem:[#allocation2 + $0xc2] sm:$0xff] }
 0x143   : > { %v1561_v54 = vadd.f32 %v1529_v15, %v1461_v35  ;;  %v1731_v1 = vmax.f32 %v1699_v47, 0.0  ;;  %v1261_v7 = vadd.f32 %v1229_v25, %v1161_v45  ;;  %v1329_v51 = vmul.f32 %v3216_v61, %v2903_v36  ;;  %v3299_v47 = vld [vmem:[#allocation2 + $0xc8] sm:$0xff] }
 0x144   : > { %v1430_v14 = vmul.f32 %v2911_v43, %v3249_v57  ;;  %v1530_v53 = vmul.f32 %v2905_v37, %v3258_v22  ;;  %v706_v42 = vmin.f32 %v674_v5, 6.0  ;;  %v1062_v48 = vadd.f32 %v1030_v50, %v962_v26  ;;  %v3301_v45 = vld [vmem:[#allocation2 + $0xc9] sm:$0xff] }
 0x145   : > { %v1661_v12 = vadd.f32 %v1629_v40, %v1561_v54  ;;  %v1763_v16 = vmin.f32 %v1731_v1, 6.0  ;;  %v1361_v20 = vadd.f32 %v1329_v51, %v1261_v7  ;;  %v1230_v21 = vmul.f32 %v2898_v32, %v1194_v8  ;;  %v3309_v1 = vld [vmem:[#allocation2 + $0xca] sm:$0xff] }
 0x146   : > { %v635_v9 = vadd.f32 %v2875_v63, %v3158_v46  ;;  %778 = vst [vmem:[#allocation2 + $0x189] sm:$0xff] %v706_v42  ;;  %v1162_v13 = vadd.f32 %v1130_v34, %v1062_v48  ;;  %v831_v27 = vmul.f32 %v3203_v3, %v2877_v0  ;;  %v931_v58 = vmul.f32 %v1193_v60, %v2879_v4 }
 0x147   : > { %v1700_v10 = vadd.f32 %v3017_v28, %v1661_v12  ;;  %2432 = vmatmul.mubr.f32.gmra.mrb[2].mxu1 %v1763_v16  ;;  %v1462_v62 = vadd.f32 %v1430_v14, %v1361_v20  ;;  %v1330_v56 = vmul.f32 %v3234_v23, %v2903_v36  ;;  %v1031_v46 = vmul.f32 %v3216_v61, %v2885_v11 }
 0x148   : > { %v673_v63 = vmax.f32 %v635_v9, 0.0  ;;  %v1262_v38 = vadd.f32 %v1230_v21, %v1162_v13  ;;  %v963_v15 = vadd.f32 %v931_v58, %v831_v27  ;;  %v1131_v3 = vmul.f32 %v3249_v57, %v2908_v41  ;;  %v3326_v13 = vld [vmem:[#allocation2 + $0xd8] sm:$0xff] }
 0x149   : > { %v1732_v2 = vmax.f32 %v1700_v10, 0.0  ;;  %v1562_v60 = vadd.f32 %v1530_v53, %v1462_v62  ;;  %v1630_v31 = vmul.f32 %v2913_v44, %v1594_v19  ;;  %v1431_v39 = vmul.f32 %v2911_v43, %v3274_v6  ;;  %v3328_v27 = vld [vmem:[#allocation2 + $0xd9] sm:$0xff] }
 0x14a   : > { %v3292_v40 = vmin.f32 %v673_v63, 6.0  ;;  %v1362_v35 = vadd.f32 %v1330_v56, %v1262_v38  ;;  %v1531_v61 = vmul.f32 %v2905_v37, %v3281_v29  ;;  %v1063_v49 = vadd.f32 %v1031_v46, %v963_v15  ;;  %v3330_v58 = vld [vmem:[#allocation2 + $0xda] sm:$0xff] }
 0x14b   : > { %v1764_v24 = vmin.f32 %v1732_v2, 6.0  ;;  %v1662_v55 = vadd.f32 %v1630_v31, %v1562_v60  ;;  %v1631_v59 = vmul.f32 %v2913_v44, %v3285_v52  ;;  %v832_v25 = vmul.f32 %v3229_v33, %v2877_v0 }
 0x14c   : > { %777 = vst [vmem:[#allocation2 + $0x181] sm:$0xff] %v3292_v40  ;;  %v932_v50 = vmul.f32 %v1194_v8, %v2879_v4  ;;  %v1463_v54 = vadd.f32 %v1431_v39, %v1362_v35  ;;  %v1163_v5 = vadd.f32 %v1131_v3, %v1063_v49  ;;  %v1231_v26 = vmul.f32 %v3258_v22, %v2898_v32 }
 0x14d   : > { %2434 = vmatprep.mubr.f32.mxu1 %v1764_v24  ;;  %v1331_v34 = vmul.f32 %v1594_v19, %v2903_v36  ;;  %v1701_v7 = vadd.f32 %v3017_v28, %v1662_v55  ;;  %v1032_v14 = vmul.f32 %v3234_v23, %v2885_v11  ;;  %v1132_v33 = vmul.f32 %v3274_v6, %v2908_v41  ;;  %v3346_v24 = vld [vmem:[#allocation2 + $0xe0] sm:$0xff] }
 0x14e   : > { %v964_v51 = vadd.f32 %v932_v50, %v832_v25  ;;  %v1563_v8 = vadd.f32 %v1531_v61, %v1463_v54  ;;  %v1263_v12 = vadd.f32 %v1231_v26, %v1163_v5  ;;  %v1432_v53 = vmul.f32 %v2911_v43, %v3299_v47  ;;  %v3354_v50 = vld [vmem:[#allocation2 + $0xe1] sm:$0xff] }
 0x14f   : > { %v1532_v42 = vmul.f32 %v2905_v37, %v3301_v45  ;;  %v1733_v48 = vmax.f32 %v1701_v7, 0.0  ;;  %v1632_v16 = vmul.f32 %v2913_v44, %v3309_v1  ;;  %v833_v21 = vmul.f32 %v3249_v57, %v2877_v0  ;;  %v3356_v54 = vld [vmem:[#allocation2 + $0xe2] sm:$0xff] }
 0x150   : > { %v1064_v20 = vadd.f32 %v1032_v14, %v964_v51  ;;  %v1663_v23 = vadd.f32 %v1631_v59, %v1563_v8  ;;  %v1363_v9 = vadd.f32 %v1331_v34, %v1263_v12  ;;  %v1232_v10 = vmul.f32 %v3281_v29, %v2898_v32 }
 0x151   : > { %v933_v62 = vmul.f32 %v3258_v22, %v2879_v4  ;;  %v1765_v56 = vmin.f32 %v1733_v48, 6.0  ;;  %v1332_v46 = vmul.f32 %v3285_v52, %v2903_v36  ;;  %v1033_v57 = vmul.f32 %v1594_v19, %v2885_v11 }
 0x152   : > { %v1164_v63 = vadd.f32 %v1132_v33, %v1064_v20  ;;  %v1702_v2 = vadd.f32 %v3017_v28, %v1663_v23  ;;  %v1464_v38 = vadd.f32 %v1432_v53, %v1363_v9  ;;  %v1133_v3 = vmul.f32 %v3299_v47, %v2908_v41  ;;  %v3371_v20 = vld [vmem:[#allocation2 + $0xf0] sm:$0xff] }
 0x153   : > { %v965_v15 = vadd.f32 %v933_v62, %v833_v21  ;;  %2435 = vmatmul.mubr.f32.gmra.mrb[4].mxu1 %v1765_v56  ;;  %v1433_v31 = vmul.f32 %v2911_v43, %v3326_v13  ;;  %v1533_v22 = vmul.f32 %v2905_v37, %v3328_v27  ;;  %v1633_v39 = vmul.f32 %v2913_v44, %v3330_v58  ;;  %v3379_v62 = vld [vmem:[#allocation2 + $0xf1] sm:$0xff] }
 0x154   : > { %v1264_v60 = vadd.f32 %v1232_v10, %v1164_v63  ;;  %v1734_v19 = vmax.f32 %v1702_v2, 0.0  ;;  %v1564_v35 = vadd.f32 %v1532_v42, %v1464_v38  ;;  %v834_v49 = vmul.f32 %v3274_v6, %v2877_v0 }
 0x155   : > { %v1065_v61 = vadd.f32 %v1033_v57, %v965_v15  ;;  %v1233_v59 = vmul.f32 %v3301_v45, %v2898_v32  ;;  %v1333_v25 = vmul.f32 %v3309_v1, %v2903_v36  ;;  %v934_v5 = vmul.f32 %v3281_v29, %v2879_v4  ;;  %v3383_v57 = vld [vmem:[#allocation2 + $0xf2] sm:$0xff] }
 0x156   : > { %v1364_v55 = vadd.f32 %v1332_v46, %v1264_v60  ;;  %v1766_v26 = vmin.f32 %v1734_v19, 6.0  ;;  %v1664_v34 = vadd.f32 %v1632_v16, %v1564_v35  ;;  %v1434_v6 = vmul.f32 %v2911_v43, %v3346_v24 }
 0x157   : > { %v1165_v7 = vadd.f32 %v1133_v3, %v1065_v61  ;;  %v966_v14 = vadd.f32 %v934_v5, %v834_v49  ;;  %v1034_v33 = vmul.f32 %v3285_v52, %v2885_v11  ;;  %v1134_v8 = vmul.f32 %v3326_v13, %v2908_v41  ;;  %v3402_v5 = vld [vmem:[#allocation2 + $0xf8] sm:$0xff] }
 0x158   : > { %v1465_v51 = vadd.f32 %v1433_v31, %v1364_v55  ;;  %2437 = vmatprep.mubr.f32.mxu1 %v1766_v26  ;;  %v1703_v12 = vadd.f32 %v3017_v28, %v1664_v34  ;;  %v1534_v29 = vmul.f32 %v2905_v37, %v3354_v50  ;;  %v1634_v42 = vmul.f32 %v2913_v44, %v3356_v54  ;;  %v3404_v26 = vld [vmem:[#allocation2 + $0xf9] sm:$0xff] }
 0x159   : > { %v1265_v53 = vadd.f32 %v1233_v59, %v1165_v7  ;;  %v1066_v16 = vadd.f32 %v1034_v33, %v966_v14  ;;  %v835_v52 = vmul.f32 %v3299_v47, %v2877_v0  ;;  %v935_v21 = vmul.f32 %v3301_v45, %v2879_v4  ;;  %v3406_v7 = vld [vmem:[#allocation2 + $0xfa] sm:$0xff] }
 0x15a   : > { %v1565_v48 = vadd.f32 %v1533_v22, %v1465_v51  ;;  %v1735_v23 = vmax.f32 %v1703_v12, 0.0  ;;  %v1234_v10 = vmul.f32 %v3328_v27, %v2898_v32  ;;  %v1035_v56 = vmul.f32 %v3309_v1, %v2885_v11 }
 0x15b   : > { %v1365_v9 = vadd.f32 %v1333_v25, %v1265_v53  ;;  %v1166_v46 = vadd.f32 %v1134_v8, %v1066_v16  ;;  %v967_v2 = vadd.f32 %v935_v21, %v835_v52  ;;  %v1135_v47 = vmul.f32 %v3346_v24, %v2908_v41 }
 0x15c   : > { %v1665_v63 = vadd.f32 %v1633_v39, %v1565_v48  ;;  %v1767_v38 = vmin.f32 %v1735_v23, 6.0  ;;  %v1334_v15 = vmul.f32 %v3330_v58, %v2903_v36  ;;  %v1435_v3 = vmul.f32 %v2911_v43, %v3371_v20 }
 0x15d   : > { %v1466_v45 = vadd.f32 %v1434_v6, %v1365_v9  ;;  %v1266_v31 = vadd.f32 %v1234_v10, %v1166_v46  ;;  %v1535_v1 = vmul.f32 %v2905_v37, %v3379_v62  ;;  %v1067_v22 = vadd.f32 %v1035_v56, %v967_v2  ;;  %v3425_v10 = vld [vmem:[#allocation2 + $0x108] sm:$0xff] }
 0x15e   : > { %v1704_v60 = vadd.f32 %v3017_v28, %v1665_v63  ;;  %2438 = vmatmul.mubr.f32.gmra.mrb[6].mxu1 %v1767_v38  ;;  %v1635_v19 = vmul.f32 %v2913_v44, %v3383_v57  ;;  %v836_v35 = vmul.f32 %v3326_v13, %v2877_v0  ;;  %v936_v61 = vmul.f32 %v3328_v27, %v2879_v4  ;;  %v3427_v56 = vld [vmem:[#allocation2 + $0x109] sm:$0xff] }
 0x15f   : > { %v1566_v39 = vadd.f32 %v1534_v29, %v1466_v45  ;;  %v1366_v55 = vadd.f32 %v1334_v15, %v1266_v31  ;;  %v1167_v59 = vadd.f32 %v1135_v47, %v1067_v22  ;;  %v1235_v25 = vmul.f32 %v3354_v50, %v2898_v32  ;;  %v3433_v38 = vld [vmem:[#allocation2 + $0x10a] sm:$0xff] }
 0x160   : > { %v1736_v49 = vmax.f32 %v1704_v60, 0.0  ;;  %v968_v6 = vadd.f32 %v936_v61, %v836_v35  ;;  %v1036_v13 = vmul.f32 %v3330_v58, %v2885_v11  ;;  %v1136_v27 = vmul.f32 %v3371_v20, %v2908_v41 }
 0x161   : > { %v1666_v34 = vadd.f32 %v1634_v42, %v1566_v39  ;;  %v1467_v14 = vadd.f32 %v1435_v3, %v1366_v55  ;;  %v1267_v33 = vadd.f32 %v1235_v25, %v1167_v59  ;;  %v1335_v8 = vmul.f32 %v3356_v54, %v2903_v36  ;;  %v3450_v59 = vld [vmem:[#allocation2 + $0x110] sm:$0xff] }
 0x162   : > { %v1768_v51 = vmin.f32 %v1736_v49, 6.0  ;;  %v1436_v53 = vmul.f32 %v2911_v43, %v3402_v5  ;;  %v1536_v29 = vmul.f32 %v2905_v37, %v3404_v26  ;;  %v1068_v42 = vadd.f32 %v1036_v13, %v968_v6  ;;  %v3452_v25 = vld [vmem:[#allocation2 + $0x111] sm:$0xff] }
 0x163   : > { %v1705_v12 = vadd.f32 %v3017_v28, %v1666_v34  ;;  %v1567_v58 = vadd.f32 %v1535_v1, %v1467_v14  ;;  %v1367_v48 = vadd.f32 %v1335_v8, %v1267_v33  ;;  %v1636_v16 = vmul.f32 %v2913_v44, %v3406_v7 }
 0x164   : > { %2440 = vmatprep.mubr.f32.mxu1 %v1768_v51  ;;  %v837_v52 = vmul.f32 %v3346_v24, %v2877_v0  ;;  %v1168_v23 = vadd.f32 %v1136_v27, %v1068_v42  ;;  %v1236_v9 = vmul.f32 %v3379_v62, %v2898_v32  ;;  %v937_v63 = vmul.f32 %v3354_v50, %v2879_v4  ;;  %v3458_v51 = vld [vmem:[#allocation2 + $0x112] sm:$0xff] }
 0x165   : > { %v1737_v21 = vmax.f32 %v1705_v12, 0.0  ;;  %v1667_v46 = vadd.f32 %v1635_v19, %v1567_v58  ;;  %v1468_v2 = vadd.f32 %v1436_v53, %v1367_v48  ;;  %v1336_v47 = vmul.f32 %v3383_v57, %v2903_v36 }
 0x166   : > { %v1037_v24 = vmul.f32 %v3356_v54, %v2885_v11  ;;  %v1268_v15 = vadd.f32 %v1236_v9, %v1168_v23  ;;  %v969_v3 = vadd.f32 %v937_v63, %v837_v52  ;;  %v1137_v60 = vmul.f32 %v3402_v5, %v2908_v41  ;;  %v3475_v23 = vld [vmem:[#allocation2 + $0x120] sm:$0xff] }
 0x167   : > { %v1769_v45 = vmin.f32 %v1737_v21, 6.0  ;;  %v1706_v31 = vadd.f32 %v3017_v28, %v1667_v46  ;;  %v1568_v1 = vadd.f32 %v1536_v29, %v1468_v2  ;;  %v1437_v50 = vmul.f32 %v2911_v43, %v3425_v10  ;;  %v3477_v9 = vld [vmem:[#allocation2 + $0x121] sm:$0xff] }
 0x168   : > { %v1537_v22 = vmul.f32 %v2905_v37, %v3427_v56  ;;  %v1368_v39 = vadd.f32 %v1336_v47, %v1268_v15  ;;  %v1637_v54 = vmul.f32 %v2913_v44, %v3433_v38  ;;  %v1069_v19 = vadd.f32 %v1037_v24, %v969_v3  ;;  %v3479_v63 = vld [vmem:[#allocation2 + $0x122] sm:$0xff] }
 0x169   : > { %2441 = vmatmul.mubr.f32.gmra.mrb[8].mxu1 %v1769_v45  ;;  %v838_v35 = vmul.f32 %v3371_v20, %v2877_v0  ;;  %v1738_v61 = vmax.f32 %v1706_v31, 0.0  ;;  %v1668_v49 = vadd.f32 %v1636_v16, %v1568_v1  ;;  %v1237_v55 = vmul.f32 %v3404_v26, %v2898_v32  ;;  %v3490_v45 = vld [vmem:[%s3910_s4] ss:$0 sm:$0xff] }
 0x16a   : > { %v938_v34 = vmul.f32 %v3379_v62, %v2879_v4  ;;  %v1469_v6 = vadd.f32 %v1437_v50, %v1368_v39  ;;  %v1169_v13 = vadd.f32 %v1137_v60, %v1069_v19  ;;  %v1337_v27 = vmul.f32 %v3406_v7, %v2903_v36 }
 0x16b   : > { %v1038_v20 = vmul.f32 %v3383_v57, %v2885_v11  ;;  %v1770_v14 = vmin.f32 %v1738_v61, 6.0  ;;  %v1707_v33 = vadd.f32 %v3017_v28, %v1668_v49  ;;  %v1138_v12 = vmul.f32 %v3425_v10, %v2908_v41 }
 0x16c   : > { %v970_v8 = vadd.f32 %v938_v34, %v838_v35  ;;  %v1569_v53 = vadd.f32 %v1537_v22, %v1469_v6  ;;  %v1269_v29 = vadd.f32 %v1237_v55, %v1169_v13  ;;  %v1438_v62 = vmul.f32 %v2911_v43, %v3450_v59  ;;  %v3501_v22 = vld [vmem:[#allocation2 + $0x128] sm:$0xff] }
 0x16d   : > { %v1538_v42 = vmul.f32 %v2905_v37, %v3452_v25  ;;  %2443 = vmatprep.mubr.f32.mxu1 %v1770_v14  ;;  %v1739_v58 = vmax.f32 %v1707_v33, 0.0  ;;  %v1638_v57 = vmul.f32 %v2913_v44, %v3458_v51  ;;  %v839_v28 = vmul.f32 %v3402_v5, %v2877_v0  ;;  %v3509_v34 = vld [vmem:[#allocation2 + $0x129] sm:$0xff] }
 0x16e   : > { %v1070_v48 = vadd.f32 %v1038_v20, %v970_v8  ;;  %v1669_v16 = vadd.f32 %v1637_v54, %v1569_v53  ;;  %v1369_v52 = vadd.f32 %v1337_v27, %v1269_v29  ;;  %v1238_v21 = vmul.f32 %v3427_v56, %v2898_v32  ;;  %v3511_v6 = vld [vmem:[#allocation2 + $0x12a] sm:$0xff] }
 0x16f   : > { %v939_v46 = vmul.f32 %v3404_v26, %v2879_v4  ;;  %v1771_v2 = vmin.f32 %v1739_v58, 6.0  ;;  %v1338_v24 = vmul.f32 %v3433_v38, %v2903_v36  ;;  %v1039_v5 = vmul.f32 %v3406_v7, %v2885_v11 }
 0x170   : > { %v1170_v47 = vadd.f32 %v1138_v12, %v1070_v48  ;;  %v1708_v15 = vadd.f32 %v3490_v45, %v1669_v16  ;;  %v1470_v3 = vadd.f32 %v1438_v62, %v1369_v52  ;;  %v1139_v26 = vmul.f32 %v3450_v59, %v2908_v41  ;;  %v3526_v48 = vld [vmem:[#allocation2 + $0x138] sm:$0xff] }
 0x171   : > { %v971_v60 = vadd.f32 %v939_v46, %v839_v28  ;;  %2444 = vmatmul.mubr.f32.gmra.mrb[10].mxu1 %v1771_v2  ;;  %v1439_v1 = vmul.f32 %v2911_v43, %v3475_v23  ;;  %v1539_v7 = vmul.f32 %v2905_v37, %v3477_v9  ;;  %v1639_v50 = vmul.f32 %v2913_v44, %v3479_v63 }
 0x172   : > { %v1270_v31 = vadd.f32 %v1238_v21, %v1170_v47  ;;  %v1740_v39 = vmax.f32 %v1708_v15, 0.0  ;;  %v1570_v54 = vadd.f32 %v1538_v42, %v1470_v3  ;;  %v840_v35 = vmul.f32 %v3425_v10, %v2877_v0 }
 0x173   : > { %v1071_v19 = vadd.f32 %v1039_v5, %v971_v60  ;;  %v1239_v49 = vmul.f32 %v3452_v25, %v2898_v32  ;;  %v1339_v55 = vmul.f32 %v3458_v51, %v2903_v36  ;;  %v940_v13 = vmul.f32 %v3427_v56, %v2879_v4 }
 0x174   : > { %v1370_v61 = vadd.f32 %v1338_v24, %v1270_v31  ;;  %v1772_v27 = vmin.f32 %v1740_v39, 6.0  ;;  %v1670_v20 = vadd.f32 %v1638_v57, %v1570_v54  ;;  %v1440_v10 = vmul.f32 %v2911_v43, %v3501_v22  ;;  %v3536_v24 = vld [vmem:[#allocation2 + $0x13a] sm:$0xff] }
 0x175   : > { %v1171_v14 = vadd.f32 %v1139_v26, %v1071_v19  ;;  %v972_v8 = vadd.f32 %v940_v13, %v840_v35  ;;  %v1040_v12 = vmul.f32 %v3433_v38, %v2885_v11  ;;  %v1140_v53 = vmul.f32 %v3475_v23, %v2908_v41 }
 0x176   : > { %v1471_v33 = vadd.f32 %v1439_v1, %v1370_v61  ;;  %2446 = vmatprep.mubr.f32.mxu1 %v1772_v27  ;;  %v1709_v29 = vadd.f32 %v3490_v45, %v1670_v20  ;;  %v1540_v56 = vmul.f32 %v2905_v37, %v3509_v34  ;;  %v1640_v42 = vmul.f32 %v2913_v44, %v3511_v6  ;;  %v3559_v27 = vld [vmem:[#allocation2 + $0x142] sm:$0xff] }
 0x177   : > { %v1271_v62 = vadd.f32 %v1239_v49, %v1171_v14  ;;  %v1072_v57 = vadd.f32 %v1040_v12, %v972_v8  ;;  %v841_v38 = vmul.f32 %v3450_v59, %v2877_v0  ;;  %v941_v28 = vmul.f32 %v3452_v25, %v2879_v4  ;;  %v1206_v12 = vld [vmem:[#allocation2 + $0x139] sm:$0xff] }
 0x178   : > { %v1571_v58 = vadd.f32 %v1539_v7, %v1471_v33  ;;  %v1741_v16 = vmax.f32 %v1709_v29, 0.0  ;;  %v1240_v21 = vmul.f32 %v3477_v9, %v2898_v32  ;;  %v1041_v46 = vmul.f32 %v3458_v51, %v2885_v11 }
 0x179   : > { %v1371_v52 = vadd.f32 %v1339_v55, %v1271_v62  ;;  %v1172_v47 = vadd.f32 %v1140_v53, %v1072_v57  ;;  %v973_v5 = vadd.f32 %v941_v28, %v841_v38  ;;  %v1141_v15 = vmul.f32 %v3501_v22, %v2908_v41  ;;  %v3555_v55 = vld [vmem:[#allocation2 + $0x140] sm:$0xff] }
 0x17a   : > { %v1671_v2 = vadd.f32 %v1639_v50, %v1571_v58  ;;  %v1773_v59 = vmin.f32 %v1741_v16, 6.0  ;;  %v1340_v25 = vmul.f32 %v3479_v63, %v2903_v36  ;;  %v1441_v60 = vmul.f32 %v2911_v43, %v3526_v48 }
 0x17b   : > { %v1472_v3 = vadd.f32 %v1440_v10, %v1371_v52  ;;  %v1272_v31 = vadd.f32 %v1240_v21, %v1172_v47  ;;  %v1541_v51 = vmul.f32 %v2905_v37, %v3137_v17  ;;  %v1073_v1 = vadd.f32 %v1041_v46, %v973_v5  ;;  %v3557_v17 = vld [vmem:[#allocation2 + $0x141] sm:$0xff]  ;;  %v3577_v52 = vld [vmem:[#allocation2 + $0x150] sm:$0xff] }
 0x17c   : > { %v1710_v26 = vadd.f32 %v3490_v45, %v1671_v2  ;;  %2447 = vmatmul.mubr.f32.gmra.mrb[12].mxu1 %v1773_v59  ;;  %v1641_v50 = vmul.f32 %v2913_v44, %v3536_v24  ;;  %v842_v39 = vmul.f32 %v3475_v23, %v2877_v0  ;;  %v942_v54 = vmul.f32 %v3477_v9, %v2879_v4  ;;  %v3583_v5 = vld [vmem:[#allocation2 + $0x152] sm:$0xff] }
 0x17d   : > { %v1572_v7 = vadd.f32 %v1540_v56, %v1472_v3  ;;  %v1372_v35 = vadd.f32 %v1340_v25, %v1272_v31  ;;  %v1173_v61 = vadd.f32 %v1141_v15, %v1073_v1  ;;  %v1241_v49 = vmul.f32 %v3509_v34, %v2898_v32 }
 0x17e   : > { %v1742_v19 = vmax.f32 %v1710_v26, 0.0  ;;  %v974_v20 = vadd.f32 %v942_v54, %v842_v39  ;;  %v1042_v23 = vmul.f32 %v3479_v63, %v2885_v11  ;;  %v1142_v9 = vmul.f32 %v3526_v48, %v2908_v41 }
 0x17f   : > { %v1672_v13 = vadd.f32 %v1640_v42, %v1572_v7  ;;  %v1473_v10 = vadd.f32 %v1441_v60, %v1372_v35  ;;  %v1273_v33 = vadd.f32 %v1241_v49, %v1173_v61  ;;  %v1341_v8 = vmul.f32 %v3511_v6, %v2903_v36  ;;  %v3602_v35 = vld [vmem:[#allocation2 + $0x159] sm:$0xff] }
 0x180   : > { %v1774_v14 = vmin.f32 %v1742_v19, 6.0  ;;  %v1442_v29 = vmul.f32 %v2911_v43, %v3555_v55  ;;  %v1542_v62 = vmul.f32 %v2905_v37, %v3557_v17  ;;  %v1074_v56 = vadd.f32 %v1042_v23, %v974_v20  ;;  %v3600_v19 = vld [vmem:[#allocation2 + $0x158] sm:$0xff] }
 0x181   : > { %v1711_v53 = vadd.f32 %v3490_v45, %v1672_v13  ;;  %v1573_v63 = vadd.f32 %v1541_v51, %v1473_v10  ;;  %v1373_v42 = vadd.f32 %v1341_v8, %v1273_v33  ;;  %v1642_v58 = vmul.f32 %v2913_v44, %v3559_v27  ;;  %v3607_v20 = vld [vmem:[#allocation2 + $0x15a] sm:$0xff]  ;;  %v1208_v33 = vld [vmem:[#allocation2 + $0x151] sm:$0xff] }
 0x182   : > { %2449 = vmatprep.mubr.f32.mxu1 %v1774_v14  ;;  %v843_v57 = vmul.f32 %v3501_v22, %v2877_v0  ;;  %v1174_v28 = vadd.f32 %v1142_v9, %v1074_v56  ;;  %v1242_v16 = vmul.f32 %v2898_v32, %v1206_v12  ;;  %v943_v21 = vmul.f32 %v3509_v34, %v2879_v4 }
 0x183   : > { %v1743_v38 = vmax.f32 %v1711_v53, 0.0  ;;  %v1673_v46 = vadd.f32 %v1641_v50, %v1573_v63  ;;  %v1474_v2 = vadd.f32 %v1442_v29, %v1373_v42  ;;  %v1342_v47 = vmul.f32 %v3536_v24, %v2903_v36 }
 0x184   : > { %v1043_v15 = vmul.f32 %v3511_v6, %v2885_v11  ;;  %v1274_v59 = vadd.f32 %v1242_v16, %v1174_v28  ;;  %v975_v3 = vadd.f32 %v943_v21, %v843_v57  ;;  %v1143_v25 = vmul.f32 %v3555_v55, %v2908_v41  ;;  %v3625_v28 = vld [vmem:[#allocation2 + $0x16a] sm:$0xff] }
 0x185   : > { %v1775_v22 = vmin.f32 %v1743_v38, 6.0  ;;  %v1712_v60 = vadd.f32 %v3490_v45, %v1673_v46  ;;  %v1574_v26 = vadd.f32 %v1542_v62, %v1474_v2  ;;  %v1443_v34 = vmul.f32 %v2911_v43, %v3577_v52  ;;  %v3623_v38 = vld [vmem:[#allocation2 + $0x168] sm:$0xff] }
 0x186   : > { %v1543_v31 = vmul.f32 %v2905_v37, %v3190_v30  ;;  %v1374_v51 = vadd.f32 %v1342_v47, %v1274_v59  ;;  %v1643_v6 = vmul.f32 %v2913_v44, %v3583_v5  ;;  %v1075_v1 = vadd.f32 %v1043_v15, %v975_v3 }
 0x187   : > { %2450 = vmatmul.mubr.f32.gmra.mrb[14].mxu1 %v1775_v22  ;;  %v844_v7 = vmul.f32 %v3526_v48, %v2877_v0  ;;  %v1744_v50 = vmax.f32 %v1712_v60, 0.0  ;;  %v1674_v39 = vadd.f32 %v1642_v58, %v1574_v26  ;;  %v1243_v54 = vmul.f32 %v3557_v17, %v2898_v32  ;;  %v3642_v26 = vld [vmem:[#allocation2 + $0x170] sm:$0xff] }
 0x188   : > { %v944_v30 = vmul.f32 %v1206_v12, %v2879_v4  ;;  %v1475_v61 = vadd.f32 %v1443_v34, %v1374_v51  ;;  %v1175_v49 = vadd.f32 %v1143_v25, %v1075_v1  ;;  %v1343_v13 = vmul.f32 %v3559_v27, %v2903_v36 }
 0x189   : > { %v1044_v48 = vmul.f32 %v3536_v24, %v2885_v11  ;;  %v1776_v23 = vmin.f32 %v1744_v50, 6.0  ;;  %v1713_v9 = vadd.f32 %v3490_v45, %v1674_v39  ;;  %v1144_v10 = vmul.f32 %v3577_v52, %v2908_v41  ;;  %v3650_v50 = vld [vmem:[#allocation2 + $0x171] sm:$0xff] }
 0x18a   : > { %v976_v14 = vadd.f32 %v944_v30, %v844_v7  ;;  %v1575_v8 = vadd.f32 %v1543_v31, %v1475_v61  ;;  %v1275_v12 = vadd.f32 %v1243_v54, %v1175_v49  ;;  %v1444_v53 = vmul.f32 %v2911_v43, %v3600_v19 }
 0x18b   : > { %v1544_v29 = vmul.f32 %v2905_v37, %v3602_v35  ;;  %2452 = vmatprep.mubr.f32.mxu1 %v1776_v23  ;;  %v1745_v62 = vmax.f32 %v1713_v9, 0.0  ;;  %v1644_v24 = vmul.f32 %v2913_v44, %v3607_v20  ;;  %v845_v63 = vmul.f32 %v3555_v55, %v2877_v0  ;;  %v1210_v9 = vld [vmem:[#allocation2 + $0x169] sm:$0xff] }
 0x18c   : > { %v1076_v56 = vadd.f32 %v1044_v48, %v976_v14  ;;  %v1675_v42 = vadd.f32 %v1643_v6, %v1575_v8  ;;  %v1375_v58 = vadd.f32 %v1343_v13, %v1275_v12  ;;  %v1244_v57 = vmul.f32 %v2898_v32, %v1208_v33 }
 0x18d   : > { %v945_v16 = vmul.f32 %v3557_v17, %v2879_v4  ;;  %v1777_v21 = vmin.f32 %v1745_v62, 6.0  ;;  %v1344_v2 = vmul.f32 %v3583_v5, %v2903_v36  ;;  %v1045_v47 = vmul.f32 %v3559_v27, %v2885_v11 }
 0x18e   : > { %v1176_v46 = vadd.f32 %v1144_v10, %v1076_v56  ;;  %v1714_v55 = vadd.f32 %v3490_v45, %v1675_v42  ;;  %v1476_v15 = vadd.f32 %v1444_v53, %v1375_v58  ;;  %v1145_v59 = vmul.f32 %v3600_v19, %v2908_v41 }
 0x18f   : > { %v977_v22 = vadd.f32 %v945_v16, %v845_v63  ;;  %2453 = vmatmul.mubr.f32.gmra.mrb[16].mxu1 %v1777_v21  ;;  %v1445_v17 = vmul.f32 %v2911_v43, %v3623_v38  ;;  %v1545_v25 = vmul.f32 %v2905_v37, %v3244_v18  ;;  %v1645_v60 = vmul.f32 %v2913_v44, %v3625_v28  ;;  %v3652_v18 = vld [vmem:[#allocation2 + $0x172] sm:$0xff]  ;;  %v1611_v16 = vld [vmem:[#allocation2 + $0x182] sm:$0xff] }
 0x190   : > { %v1276_v3 = vadd.f32 %v1244_v57, %v1176_v46  ;;  %v1746_v27 = vmax.f32 %v1714_v55, 0.0  ;;  %v1576_v34 = vadd.f32 %v1544_v29, %v1476_v15  ;;  %v846_v51 = vmul.f32 %v3577_v52, %v2877_v0  ;;  %v1411_v29 = vld [vmem:[#allocation2 + $0x180] sm:$0xff] }
 0x191   : > { %v1077_v31 = vadd.f32 %v1045_v47, %v977_v22  ;;  %v1245_v1 = vmul.f32 %v3602_v35, %v2898_v32  ;;  %v1345_v7 = vmul.f32 %v3607_v20, %v2903_v36  ;;  %v946_v39 = vmul.f32 %v1208_v33, %v2879_v4 }
 0x192   : > { %v1376_v6 = vadd.f32 %v1344_v2, %v1276_v3  ;;  %v1778_v54 = vmin.f32 %v1746_v27, 6.0  ;;  %v1676_v30 = vadd.f32 %v1644_v24, %v1576_v34  ;;  %v1446_v49 = vmul.f32 %v2911_v43, %v3642_v26 }
 0x193   : > { %v1177_v61 = vadd.f32 %v1145_v59, %v1077_v31  ;;  %v978_v13 = vadd.f32 %v946_v39, %v846_v51  ;;  %v1046_v48 = vmul.f32 %v3583_v5, %v2885_v11  ;;  %v1146_v23 = vmul.f32 %v3623_v38, %v2908_v41  ;;  %v1412_v51 = vld [vmem:[#allocation2 + $0x188] sm:$0xff] }
 0x194   : > { %v1477_v52 = vadd.f32 %v1445_v17, %v1376_v6  ;;  %2455 = vmatprep.mubr.f32.mxu1 %v1778_v54  ;;  %v1715_v14 = vadd.f32 %v3490_v45, %v1676_v30  ;;  %v1546_v33 = vmul.f32 %v2905_v37, %v3650_v50  ;;  %v1646_v8 = vmul.f32 %v2913_v44, %v3652_v18  ;;  %v1512_v6 = vld [vmem:[#allocation2 + $0x189] sm:$0xff]  ;;  %v1212_v54 = vld [vmem:[#allocation2 + $0x181] sm:$0xff] }
 0x195   : > { %v1277_v10 = vadd.f32 %v1245_v1, %v1177_v61  ;;  %v1078_v53 = vadd.f32 %v1046_v48, %v978_v13  ;;  %v847_v5 = vmul.f32 %v3600_v19, %v2877_v0  ;;  %v947_v62 = vmul.f32 %v3602_v35, %v2879_v4 }
 0x196   : > { %v1577_v12 = vadd.f32 %v1545_v25, %v1477_v52  ;;  %v1747_v24 = vmax.f32 %v1715_v14, 0.0  ;;  %v1246_v63 = vmul.f32 %v2898_v32, %v1210_v9  ;;  %v1047_v42 = vmul.f32 %v3607_v20, %v2885_v11 }
 0x197   : > { %v1377_v56 = vadd.f32 %v1345_v7, %v1277_v10  ;;  %v1178_v57 = vadd.f32 %v1146_v23, %v1078_v53  ;;  %v979_v21 = vadd.f32 %v947_v62, %v847_v5  ;;  %v1147_v46 = vmul.f32 %v3642_v26, %v2908_v41 }
 0x198   : > { %v1677_v58 = vadd.f32 %v1645_v60, %v1577_v12  ;;  %v1779_v2 = vmin.f32 %v1747_v24, 6.0  ;;  %v1346_v19 = vmul.f32 %v3625_v28, %v2903_v36  ;;  %v1447_v35 = vmul.f32 %v2911_v43, %v1411_v29  ;;  %v2558_v24 = vld [vmem:[#allocation2] sm:$0xff] }
 0x199   : > { %v1478_v47 = vadd.f32 %v1446_v49, %v1377_v56  ;;  %v1278_v15 = vadd.f32 %v1246_v63, %v1178_v57  ;;  %v1547_v20 = vmul.f32 %v2905_v37, %v3292_v40  ;;  %v1079_v22 = vadd.f32 %v1047_v42, %v979_v21  ;;  %v1513_v63 = vld [vmem:[#allocation2 + $0x199] sm:$0xff] }
 0x19a   : > { %v1716_v55 = vadd.f32 %v3490_v45, %v1677_v58  ;;  %2456 = vmatmul.mubr.f32.gmra.mrb[18].mxu1 %v1779_v2  ;;  %v1647_v3 = vmul.f32 %v2913_v44, %v1611_v16  ;;  %v848_v17 = vmul.f32 %v3623_v38, %v2877_v0  ;;  %v948_v25 = vmul.f32 %v1210_v9, %v2879_v4 }
 0x19b   : > { %v1578_v59 = vadd.f32 %v1546_v33, %v1478_v47  ;;  %v1378_v27 = vadd.f32 %v1346_v19, %v1278_v15  ;;  %v1179_v34 = vadd.f32 %v1147_v46, %v1079_v22  ;;  %v1247_v31 = vmul.f32 %v3650_v50, %v2898_v32 }
 0x19c   : > { %v1748_v60 = vmax.f32 %v1716_v55, 0.0  ;;  %v980_v40 = vadd.f32 %v948_v25, %v848_v17  ;;  %v1048_v7 = vmul.f32 %v3625_v28, %v2885_v11  ;;  %v1148_v39 = vmul.f32 %v1411_v29, %v2908_v41  ;;  %v1614_v25 = vld [vmem:[#allocation2 + $0x1a2] sm:$0xff] }
 0x19d   : > { %v1678_v1 = vadd.f32 %v1646_v8, %v1578_v59  ;;  %v1479_v38 = vadd.f32 %v1447_v35, %v1378_v27  ;;  %v1279_v61 = vadd.f32 %v1247_v31, %v1179_v34  ;;  %v1347_v49 = vmul.f32 %v3652_v18, %v2903_v36  ;;  %v1612_v8 = vld [vmem:[#allocation2 + $0x18a] sm:$0xff] }
 0x19e   : > { %v1780_v30 = vmin.f32 %v1748_v60, 6.0  ;;  %v1448_v13 = vmul.f32 %v2911_v43, %v1412_v51  ;;  %v1548_v48 = vmul.f32 %v2905_v37, %v1512_v6  ;;  %v1080_v23 = vadd.f32 %v1048_v7, %v980_v40 }
 0x19f   : > { %v1717_v52 = vadd.f32 %v3490_v45, %v1678_v1  ;;  %v1579_v9 = vadd.f32 %v1547_v20, %v1479_v38  ;;  %v1379_v14 = vadd.f32 %v1347_v49, %v1279_v61  ;;  %v1248_v28 = vmul.f32 %v2898_v32, %v1212_v54  ;;  %v1514_v20 = vld [vmem:[#allocation2 + $0x1a1] sm:$0xff] }
 0x1a0   : > { %2458 = vmatprep.mubr.f32.mxu1 %v1780_v30  ;;  %v849_v10 = vmul.f32 %v3642_v26, %v2877_v0  ;;  %v1180_v12 = vadd.f32 %v1148_v39, %v1080_v23  ;;  %v1348_v53 = vmul.f32 %v1611_v16, %v2903_v36  ;;  %v949_v29 = vmul.f32 %v3650_v50, %v2879_v4  ;;  %v1613_v4 = vld [vmem:[#allocation2 + $0x19a] sm:$0xff]  ;;  %v2559_v38 = vld [vmem:[%s2755_s19 + $0x8] sm:$0xff] }
 0x1a1   : > { %v1749_v33 = vmax.f32 %v1717_v52, 0.0  ;;  %v1679_v5 = vadd.f32 %v1647_v3, %v1579_v9  ;;  %v1480_v62 = vadd.f32 %v1448_v13, %v1379_v14  ;;  %v1449_v56 = vmul.f32 %v2558_v24, %v2911_v43  ;;  %v2560_v49 = vld [vmem:[%s2755_s19] sm:$0xff] }
 0x1a2   : > { %v1049_v42 = vmul.f32 %v3652_v18, %v2885_v11  ;;  %v1280_v57 = vadd.f32 %v1248_v28, %v1180_v12  ;;  %v981_v0 = vadd.f32 %v949_v29, %v849_v10  ;;  %v1149_v26 = vmul.f32 %v1412_v51, %v2908_v41  ;;  %v2561_v28 = vld [vmem:[%s2755_s19 + $0x18] sm:$0xff]  ;;  %v2562_v12 = vld [vmem:[%s2755_s19 + $0x10] sm:$0xff] }
 0x1a3   : > { %v1781_v58 = vmin.f32 %v1749_v33, 6.0  ;;  %v1718_v21 = vadd.f32 %v3490_v45, %v1679_v5  ;;  %v1580_v16 = vadd.f32 %v1548_v48, %v1480_v62  ;;  %v1648_v46 = vmul.f32 %v2913_v44, %v1612_v8 }
 0x1a4   : > { %v1380_v50 = vadd.f32 %v1348_v53, %v1280_v57  ;;  %v1549_v2 = vmul.f32 %v2905_v37, %v1513_v63  ;;  %v1081_v43 = vadd.f32 %v1049_v42, %v981_v0  ;;  %v1649_v11 = vmul.f32 %v2913_v44, %v1613_v4  ;;  %v2564_v57 = vld [vmem:[%s2755_s19 + $0x20] sm:$0xff]  ;;  %v2565_v4 = vld [vmem:[%s2755_s19 + $0x38] sm:$0xff] }
 0x1a5   : > { %2459 = vmatmul.mubr.f32.gmra.mrb[20].mxu1 %v1781_v58  ;;  %v1750_v47 = vmax.f32 %v1718_v21, 0.0  ;;  %v1680_v19 = vadd.f32 %v1648_v46, %v1580_v16  ;;  %v1249_v55 = vmul.f32 %v1512_v6, %v2898_v32  ;;  %v1349_v3 = vmul.f32 %v1612_v8, %v2903_v36 }
 0x1a6   : > { %v1481_v35 = vadd.f32 %v1449_v56, %v1380_v50  ;;  %v1181_v18 = vadd.f32 %v1149_v26, %v1081_v43  ;;  %v1550_v34 = vmul.f32 %v2905_v37, %v1514_v20  ;;  %v1650_v6 = vmul.f32 %v2913_v44, %v1614_v25  ;;  %v3720_v37 = vld [vmem:[%s3912_s6] ss:$0 sm:$0xff] }
 0x1a7   : > { %v1782_v41 = vmin.f32 %v1750_v47, 6.0  ;;  %v1719_v15 = vadd.f32 %v3490_v45, %v1680_v19  ;;  %v2035_v61 = vsel %vm317_vm1, %v2559_v38, 0.0  ;;  %v2037_v10 = vsel %vm317_vm1, %v2561_v28, 0.0  ;;  %v2566_v47 = vld [vmem:[%s2755_s19 + $0x30] sm:$0xff] }
 0x1a8   : > { %v1581_v22 = vadd.f32 %v1549_v2, %v1481_v35  ;;  %v1281_v59 = vadd.f32 %v1249_v55, %v1181_v18  ;;  %v2036_v53 = vsel %vm317_vm1, %v2562_v12, 0.0  ;;  %v2038_v0 = vsel %vm317_vm1, %v2564_v57, 0.0 }
 0x1a9   : > { %2461 = vmatprep.mubr.f32.mxu1 %v1782_v41  ;;  %v1751_v17 = vmax.f32 %v1719_v15, 0.0  ;;  %v2041_v50 = vsel %vm317_vm1, %v2565_v4, 0.0  ;;  %v2040_v19 = vsel %vm317_vm1, %v2566_v47, 0.0  ;;  %v2567_v41 = vld [vmem:[%s2755_s19 + $0x48] sm:$0xff] }
 0x1aa   : > { %v1681_v60 = vadd.f32 %v1649_v11, %v1581_v22  ;;  %v1381_v27 = vadd.f32 %v1349_v3, %v1281_v59  ;;  %v2043_v15 = vsel %vm317_vm1, %v2567_v41, 0.0  ;;  %v2568_v59 = vld [vmem:[%s2755_s19 + $0x40] sm:$0xff] }
 0x1ab   : > { %v1783_v31 = vmin.f32 %v1751_v17, 6.0  ;;  %v2042_v3 = vsel %vm317_vm1, %v2568_v59, 0.0 }
 0x1ac   : > { %v1720_v32 = vadd.f32 %v3490_v45, %v1681_v60  ;;  %v1482_v51 = vadd.f32 %v1449_v56, %v1381_v27  ;;  %v2563_v56 = vld [vmem:[%s2755_s19 + $0x28] sm:$0xff] }
 0x1ad   : > { %2462 = vmatmul.mubr.f32.gmra.mrb[22].mxu1 %v1783_v31  ;;  %v2039_v63 = vsel %vm317_vm1, %v2563_v56, 0.0 }
 0x1ae   : > { %v1752_v1 = vmax.f32 %v1720_v32, 0.0  ;;  %v1582_v36 = vadd.f32 %v1550_v34, %v1482_v51  ;;  %v2569_v34 = vld [vmem:[%s2755_s19 + $0x58] sm:$0xff] }
 0x1af   : > { %v2045_v31 = vsel %vm317_vm1, %v2569_v34, 0.0 }
 0x1b0   : > { %v1784_v40 = vmin.f32 %v1752_v1, 6.0  ;;  %v1682_v7 = vadd.f32 %v1650_v6, %v1582_v36  ;;  %v2570_v6 = vld [vmem:[%s2755_s19 + $0x50] sm:$0xff] }
 0x1b1   : > { %v2044_v1 = vsel %vm317_vm1, %v2570_v6, 0.0 }
 0x1b2   : > { %2464 = vmatprep.mubr.f32.mxu1 %v1784_v40  ;;  %v1721_v39 = vadd.f32 %v3490_v45, %v1682_v7  ;;  %v2034_v45 = vsel %vm317_vm1, %v2560_v49, 0.0 }
 0x1b4   : > { %v1753_v54 = vmax.f32 %v1721_v39, 0.0 }
 0x1b6   : > { %v1785_v30 = vmin.f32 %v1753_v54, 6.0  ;;  %v2571_v54 = vld [vmem:[%s2755_s19 + $0x68] sm:$0xff] }
 0x1b8   : > { %2465 = vmatmul.mubr.f32.gmra.mrb[24].mxu1 %v1785_v30  ;;  %v2047_v30 = vsel %vm317_vm1, %v2571_v54, 0.0 }
 0x1e6   : > { %v2421_v44 = vpop.f32.mrb[32].mxu0 }
 0x1e7   : > { %v1881_v52 = vadd.f32 %v2421_v44, %v3720_v37  ;;  %v1875_v13 = vpop.f32.mrb[33].mxu0 }
 0x1e8   : > { %v1876_v48 = vadd.f32 %v3720_v37, %v1875_v13 }
 0x1e9   : > { %v2067_v23 = vadd.f32 %v2035_v61, %v1881_v52  ;;  %v2572_v61 = vld [vmem:[%s2755_s19 + $0x60] sm:$0xff] }
 0x1ea   : > { %v2066_v9 = vadd.f32 %v2034_v45, %v1876_v48  ;;  %v2046_v49 = vsel %vm317_vm1, %v2572_v61, 0.0 }
 0x1eb   : > { %2099 = vst [vmem:[%s3730_s15 + $0x8] sm:$0xff] %v2067_v23  ;;  %v2573_v23 = vld [vmem:[%s2755_s19 + $0x78] sm:$0xff] }
 0x1ec   : > { %2098 = vst [vmem:[%s3730_s15] sm:$0xff] %v2066_v9  ;;  %v2049_v9 = vsel %vm317_vm1, %v2573_v23, 0.0 }
 0x1f3   : > { %v2424_v14 = vpop.f32.mrb[34].mxu0 }
 0x1f4   : > { %v1891_v33 = vadd.f32 %v2424_v14, %v3720_v37  ;;  %v1885_v8 = vpop.f32.mrb[35].mxu0 }
 0x1f5   : > { %v1886_v29 = vadd.f32 %v3720_v37, %v1885_v8 }
 0x1f6   : > { %v2069_v5 = vadd.f32 %v2037_v10, %v1891_v33  ;;  %v2574_v10 = vld [vmem:[%s2755_s19 + $0x70] sm:$0xff] }
 0x1f7   : > { %v2068_v62 = vadd.f32 %v2036_v53, %v1886_v29  ;;  %v2048_v33 = vsel %vm317_vm1, %v2574_v10, 0.0 }
 0x1f8   : > { %2101 = vst [vmem:[%s3730_s15 + $0x18] sm:$0xff] %v2069_v5  ;;  %v2575_v5 = vld [vmem:[%s2755_s19 + $0x88] sm:$0xff] }
 0x1f9   : > { %2100 = vst [vmem:[%s3730_s15 + $0x10] sm:$0xff] %v2068_v62  ;;  %v2051_v62 = vsel %vm317_vm1, %v2575_v5, 0.0 }
 0x204   : > { %v2427_v24 = vpop.f32.mrb[36].mxu0 }
 0x205   : > { %v1901_v42 = vadd.f32 %v2427_v24, %v3720_v37  ;;  %v1895_v58 = vpop.f32.mrb[37].mxu0 }
 0x206   : > { %v1896_v26 = vadd.f32 %v3720_v37, %v1895_v58 }
 0x207   : > { %v2071_v21 = vadd.f32 %v2039_v63, %v1901_v42  ;;  %v2576_v63 = vld [vmem:[%s2755_s19 + $0x80] sm:$0xff] }
 0x208   : > { %v2070_v16 = vadd.f32 %v2038_v0, %v1896_v26  ;;  %v2050_v42 = vsel %vm317_vm1, %v2576_v63, 0.0 }
 0x209   : > { %2103 = vst [vmem:[%s3730_s15 + $0x28] sm:$0xff] %v2071_v21  ;;  %v2577_v21 = vld [vmem:[%s2755_s19 + $0x98] sm:$0xff] }
 0x20a   : > { %2102 = vst [vmem:[%s3730_s15 + $0x20] sm:$0xff] %v2070_v16  ;;  %v2053_v16 = vsel %vm317_vm1, %v2577_v21, 0.0 }
 0x20f   : > { %v2430_v46 = vpop.f32.mrb[0].mxu1 }
 0x210   : > { %v1911_v2 = vadd.f32 %v2430_v46, %v3720_v37  ;;  %v1905_v43 = vpop.f32.mrb[1].mxu1 }
 0x211   : > { %v1906_v35 = vadd.f32 %v3720_v37, %v1905_v43 }
 0x212   : > { %v2073_v11 = vadd.f32 %v2041_v50, %v1911_v2  ;;  %v2578_v50 = vld [vmem:[%s2755_s19 + $0x90] sm:$0xff] }
 0x213   : > { %v2072_v18 = vadd.f32 %v2040_v19, %v1906_v35  ;;  %v2052_v2 = vsel %vm317_vm1, %v2578_v50, 0.0 }
 0x214   : > { %2105 = vst [vmem:[%s3730_s15 + $0x38] sm:$0xff] %v2073_v11  ;;  %v2579_v11 = vld [vmem:[%s2755_s19 + $0xa8] sm:$0xff] }
 0x215   : > { %2104 = vst [vmem:[%s3730_s15 + $0x30] sm:$0xff] %v2072_v18  ;;  %v2055_v18 = vsel %vm317_vm1, %v2579_v11, 0.0 }
 0x21a   : > { %v2433_v55 = vpop.f32.mrb[2].mxu1 }
 0x21b   : > { %v1921_v20 = vadd.f32 %v2433_v55, %v3720_v37  ;;  %v1915_v22 = vpop.f32.mrb[3].mxu1 }
 0x21c   : > { %v1916_v17 = vadd.f32 %v3720_v37, %v1915_v22 }
 0x21d   : > { %v2075_v25 = vadd.f32 %v2043_v15, %v1921_v20  ;;  %v2580_v15 = vld [vmem:[%s2755_s19 + $0xa0] sm:$0xff] }
 0x21e   : > { %v2074_v60 = vadd.f32 %v2042_v3, %v1916_v17  ;;  %v2054_v20 = vsel %vm317_vm1, %v2580_v15, 0.0 }
 0x21f   : > { %2107 = vst [vmem:[%s3730_s15 + $0x48] sm:$0xff] %v2075_v25  ;;  %v2581_v25 = vld [vmem:[%s2755_s19 + $0xb8] sm:$0xff] }
 0x220   : > { %2106 = vst [vmem:[%s3730_s15 + $0x40] sm:$0xff] %v2074_v60  ;;  %v2057_v60 = vsel %vm317_vm1, %v2581_v25, 0.0 }
 0x226   : > { %v2436_v27 = vpop.f32.mrb[4].mxu1 }
 0x227   : > { %v1931_v32 = vadd.f32 %v2436_v27, %v3720_v37  ;;  %v1925_v51 = vpop.f32.mrb[5].mxu1 }
 0x228   : > { %v1926_v36 = vadd.f32 %v3720_v37, %v1925_v51 }
 0x229   : > { %v2077_v40 = vadd.f32 %v2045_v31, %v1931_v32  ;;  %v2582_v31 = vld [vmem:[%s2755_s19 + $0xb0] sm:$0xff] }
 0x22a   : > { %v2076_v7 = vadd.f32 %v2044_v1, %v1926_v36  ;;  %v2056_v32 = vsel %vm317_vm1, %v2582_v31, 0.0 }
 0x22b   : > { %2109 = vst [vmem:[%s3730_s15 + $0x58] sm:$0xff] %v2077_v40  ;;  %v2583_v40 = vld [vmem:[%s2755_s19 + $0xc8] sm:$0xff] }
 0x22c   : > { %2108 = vst [vmem:[%s3730_s15 + $0x50] sm:$0xff] %v2076_v7  ;;  %v2059_v7 = vsel %vm317_vm1, %v2583_v40, 0.0 }
 0x231   : > { %v2439_v39 = vpop.f32.mrb[6].mxu1 }
 0x232   : > { %v1941_v44 = vadd.f32 %v2439_v39, %v3720_v37  ;;  %v1935_v38 = vpop.f32.mrb[7].mxu1 }
 0x233   : > { %v1936_v45 = vadd.f32 %v3720_v37, %v1935_v38 }
 0x234   : > { %v2079_v52 = vadd.f32 %v2047_v30, %v1941_v44  ;;  %v2584_v30 = vld [vmem:[%s2755_s19 + $0xc0] sm:$0xff] }
 0x235   : > { %v2078_v13 = vadd.f32 %v2046_v49, %v1936_v45  ;;  %v2058_v44 = vsel %vm317_vm1, %v2584_v30, 0.0 }
 0x236   : > { %2111 = vst [vmem:[%s3730_s15 + $0x68] sm:$0xff] %v2079_v52  ;;  %v2585_v52 = vld [vmem:[%s2755_s19 + $0xd8] sm:$0xff] }
 0x237   : > { %2110 = vst [vmem:[%s3730_s15 + $0x60] sm:$0xff] %v2078_v13  ;;  %v2061_v13 = vsel %vm317_vm1, %v2585_v52, 0.0 }
 0x23c   : > { %v2442_v48 = vpop.f32.mrb[8].mxu1 }
 0x23d   : > { %v1951_v14 = vadd.f32 %v2442_v48, %v3720_v37  ;;  %v1945_v28 = vpop.f32.mrb[9].mxu1 }
 0x23e   : > { %v1946_v8 = vadd.f32 %v3720_v37, %v1945_v28 }
 0x23f   : > { %v2081_v12 = vadd.f32 %v2049_v9, %v1951_v14  ;;  %v2586_v9 = vld [vmem:[%s2755_s19 + $0xd0] sm:$0xff] }
 0x240   : > { %v2080_v53 = vadd.f32 %v2048_v33, %v1946_v8  ;;  %v2060_v14 = vsel %vm317_vm1, %v2586_v9, 0.0 }
 0x241   : > { %2113 = vst [vmem:[%s3730_s15 + $0x78] sm:$0xff] %v2081_v12  ;;  %v2587_v12 = vld [vmem:[%s2755_s19 + $0xe8] sm:$0xff] }
 0x242   : > { %2112 = vst [vmem:[%s3730_s15 + $0x70] sm:$0xff] %v2080_v53  ;;  %v2063_v53 = vsel %vm317_vm1, %v2587_v12, 0.0 }
 0x244   : > { %v2445_v29 = vpop.f32.mrb[10].mxu1 }
 0x245   : > { %v1961_v24 = vadd.f32 %v2445_v29, %v3720_v37  ;;  %v1955_v56 = vpop.f32.mrb[11].mxu1 }
 0x246   : > { %v1956_v58 = vadd.f32 %v3720_v37, %v1955_v56 }
 0x247   : > { %v2083_v57 = vadd.f32 %v2051_v62, %v1961_v24  ;;  %v2588_v62 = vld [vmem:[%s2755_s19 + $0xe0] sm:$0xff] }
 0x248   : > { %v2082_v0 = vadd.f32 %v2050_v42, %v1956_v58  ;;  %v2062_v24 = vsel %vm317_vm1, %v2588_v62, 0.0 }
 0x249   : > { %2115 = vst [vmem:[%s3730_s15 + $0x88] sm:$0xff] %v2083_v57  ;;  %v2589_v57 = vld [vmem:[%s2755_s19 + $0xf8] sm:$0xff] }
 0x24a   : > { %2114 = vst [vmem:[%s3730_s15 + $0x80] sm:$0xff] %v2082_v0  ;;  %v2065_v0 = vsel %vm317_vm1, %v2589_v57, 0.0 }
 0x24f   : > { %v2448_v26 = vpop.f32.mrb[12].mxu1 }
 0x250   : > { %v1971_v46 = vadd.f32 %v2448_v26, %v3720_v37  ;;  %v1965_v4 = vpop.f32.mrb[13].mxu1 }
 0x251   : > { %v1966_v43 = vadd.f32 %v3720_v37, %v1965_v4 }
 0x252   : > { %v2085_v47 = vadd.f32 %v2053_v16, %v1971_v46  ;;  %v2590_v16 = vld [vmem:[%s2755_s19 + $0xf0] sm:$0xff]  ;;  %s2591_s19 = scalar_lea.vmem %s3859_s17, 4096 }
 0x253   : > { %v2084_v19 = vadd.f32 %v2052_v2, %v1966_v43  ;;  %v2064_v46 = vsel %vm317_vm1, %v2590_v16, 0.0  ;;  %p2592_p11 = scmp.ne.s32.totalorder %s3859_s17, %s2591_s19  ;;  %p2599_p1 = scmp.lt.s32.totalorder %s2597_s29, %s2591_s19 }
 0x254   : > { %2117 = vst [vmem:[%s3730_s15 + $0x98] sm:$0xff] %v2085_v47 }
 0x255   : > { %2116 = vst [vmem:[%s3730_s15 + $0x90] sm:$0xff] %v2084_v19  ;;  %p2593_p12 = pnand %p2592_p11, %p2737_p5  ;;  %p2600_p2 = por %p2599_p1, %p2598_p0 }
 0x257   : > { %p2594_p13 = pneg %p2593_p12 }
 0x259   : > { %p2601_p3 = pnand %p2600_p2, %p2594_p13 }
 0x25a   : > { %v2451_v35 = vpop.f32.mrb[14].mxu1 }
 0x25b   : > { %v1981_v55 = vadd.f32 %v2451_v35, %v3720_v37  ;;  %v1975_v41 = vpop.f32.mrb[15].mxu1 }
 0x25c   : > { %v1976_v22 = vadd.f32 %v3720_v37, %v1975_v41 }
 0x25d   : > { %v2087_v59 = vadd.f32 %v2055_v18, %v1981_v55 }
 0x25e   : > { %v2086_v3 = vadd.f32 %v2054_v20, %v1976_v22 }
 0x25f   : > { %2119 = vst [vmem:[%s3730_s15 + $0xa8] sm:$0xff] %v2087_v59 }
 0x260   : > { %2118 = vst [vmem:[%s3730_s15 + $0xa0] sm:$0xff] %v2086_v3 }
 0x262   : > { %v2454_v17 = vpop.f32.mrb[16].mxu1 }
 0x263   : > { %v1991_v27 = vadd.f32 %v2454_v17, %v3720_v37  ;;  %v1985_v34 = vpop.f32.mrb[17].mxu1 }
 0x264   : > { %v1986_v51 = vadd.f32 %v3720_v37, %v1985_v34 }
 0x265   : > { %v2089_v6 = vadd.f32 %v2057_v60, %v1991_v27 }
 0x266   : > { %v2088_v1 = vadd.f32 %v2056_v32, %v1986_v51 }
 0x267   : > { %2121 = vst [vmem:[%s3730_s15 + $0xb8] sm:$0xff] %v2089_v6 }
 0x268   : > { %2120 = vst [vmem:[%s3730_s15 + $0xb0] sm:$0xff] %v2088_v1 }
 0x26d   : > { %v2457_v36 = vpop.f32.mrb[18].mxu1 }
 0x26e   : > { %v2001_v39 = vadd.f32 %v2457_v36, %v3720_v37  ;;  %v1995_v54 = vpop.f32.mrb[19].mxu1 }
 0x26f   : > { %v1996_v38 = vadd.f32 %v3720_v37, %v1995_v54 }
 0x270   : > { %v2091_v61 = vadd.f32 %v2059_v7, %v2001_v39 }
 0x271   : > { %v2090_v49 = vadd.f32 %v2058_v44, %v1996_v38 }
 0x272   : > { %2123 = vst [vmem:[%s3730_s15 + $0xc8] sm:$0xff] %v2091_v61 }
 0x273   : > { %2122 = vst [vmem:[%s3730_s15 + $0xc0] sm:$0xff] %v2090_v49 }
 0x278   : > { %v2460_v45 = vpop.f32.mrb[20].mxu1 }
 0x279   : > { %v2011_v48 = vadd.f32 %v2460_v45, %v3720_v37  ;;  %v2005_v23 = vpop.f32.mrb[21].mxu1 }
 0x27a   : > { %v2006_v28 = vadd.f32 %v3720_v37, %v2005_v23 }
 0x27b   : > { %v2093_v10 = vadd.f32 %v2061_v13, %v2011_v48 }
 0x27c   : > { %v2092_v33 = vadd.f32 %v2060_v14, %v2006_v28 }
 0x27d   : > { %2125 = vst [vmem:[%s3730_s15 + $0xd8] sm:$0xff] %v2093_v10 }
 0x27e   : > { %2124 = vst [vmem:[%s3730_s15 + $0xd0] sm:$0xff] %v2092_v33 }
 0x280   : > { %v2463_v8 = vpop.f32.mrb[22].mxu1 }
 0x281   : > { %v2021_v29 = vadd.f32 %v2463_v8, %v3720_v37  ;;  %v2015_v5 = vpop.f32.mrb[23].mxu1 }
 0x282   : > { %v2016_v56 = vadd.f32 %v3720_v37, %v2015_v5 }
 0x283   : > { %v2095_v63 = vadd.f32 %v2063_v53, %v2021_v29 }
 0x284   : > { %v2094_v42 = vadd.f32 %v2062_v24, %v2016_v56 }
 0x285   : > { %2127 = vst [vmem:[%s3730_s15 + $0xe8] sm:$0xff] %v2095_v63 }
 0x286   : > { %2126 = vst [vmem:[%s3730_s15 + $0xe0] sm:$0xff] %v2094_v42 }
 0x28b   : > { %v2466_v58 = vpop.f32.mrb[24].mxu1 }
 0x28c   : > { %v2031_v26 = vadd.f32 %v2466_v58, %v3720_v37  ;;  %v2025_v21 = vpop.f32.mrb[25].mxu1 }
 0x28d   : > { %v2026_v4 = vadd.f32 %v3720_v37, %v2025_v21 }
 0x28e   : > { %v2097_v50 = vadd.f32 %v2065_v0, %v2031_v26 }
 0x28f   : > { %v2096_v2 = vadd.f32 %v2064_v46, %v2026_v4 }
 0x290   : > { %2129 = vst [vmem:[%s3730_s15 + $0xf8] sm:$0xff] %v2097_v50 }
 0x291   : > { %2128 = vst [vmem:[%s3730_s15 + $0xf0] sm:$0xff] %v2096_v2 }
 0x292   : > { %2604 = shalt.err (!%p2601_p3)
}
 0x293   : > { %s2605_s8 = scalar_lea.hbm %s3857_s21, 4096  ;;  %s2609_s14 = scalar_lea.hbm %s3913_s7, 8192 }
 0x294   : > { %p2606_p4 = scmp.ne.s32.totalorder %s3857_s21, %s2605_s8  ;;  %p2610_p9 = scmp.lt.u32.totalorder %s3857_s21, %s3913_s7 }
 0x295   : > { %p2611_p10 = scmp.lt.u32.totalorder %s2609_s14, %s2605_s8  ;;  %p2613_p12 = scmp.lt.u32.totalorder %s2605_s8, %s3857_s21 }
 0x296   : > { %p2607_p7 = pnand %p2606_p4, %p2737_p5 }
 0x297   : > { %p2612_p11 = por %p2611_p10, %p2610_p9 }
 0x298   : > { %p2608_p8 = pneg %p2607_p7 }
 0x299   : > { %p2614_p13 = por %p2613_p12, %p2612_p11 }
 0x29b   : > { %p2615_p0 = pnand %p2614_p13, %p2608_p8 }
 0x29d   : > { %2618 = shalt.err (!%p2615_p0)
}
 0x29e   : > { %s2657_s18 = smov 128   ;;  %s2658_s20 = smov 8  }
 0x29f   : > { %2515 = dma.vmem_to_hbm [thread:$0]  (%p2737_p5), %s3859_s17, 4096, %s3857_s21, %s3865_s28, %s2657_s18, %s2657_s18, %s2658_s20  }
 0x2a0 PF: > { %p2521_p1 = scmp.ge.s32.totalorder %s2653_s27, 2  ;;  %s2159_s19 = sand.u32 1, %s2641_s24  }
 0x2a1   : > { %s2160_s22 = scalar_lea.sflag [#allocation4], %s2159_s19 }
 0x2a2   : > { %p2518_p2 = pnand %p2521_p1, %p2741_p6 }
 0x2a4   : > { %2636 = dma.done.wait (!%p2518_p2), %s2160_s22, 4096  }
 0x2a5   : > { %2638 = vsyncadd (!%p2518_p2), %s2160_s22, 4294963200  ;;  %p17_p3 = scmp.ge.s32.totalorder %s2724_s30, 4   ;;  %s3916_s24 = smov %s2645_s25 }
 0x2a6   : > { %s3917_s25 = smov %s2649_s26  ;;  %s3918_s26 = smov %s2735_s10 }
 0x2a7   : > { %s3919_s27 = smov %s2724_s30  ;;  %19 = sbr.rel (!%p17_p3) target bundleno = 3 (0x3), region = 86 }
 0x2ae   :  { %2165 = vsyncpa [#allocation4], 1 }
 0x2af   :  { %2167 = vsyncpa [#allocation4 + $0x1], 1 }

</bundles_post_ra>
